<compile_context>
chip_gen: v5e
topology: v5e:2x2
jax: 0.10.0
libtpu: 0.0.40
codegen_flags: <defaults>
</compile_context>

<pallas_src>
import functools

import numpy as np
import jax
import jax.numpy as jnp
from jax import lax
from jax.experimental import pallas as pl
from jax.experimental.pallas import tpu as pltpu


def _vmem_limit_bytes():
    """Generation-aware VMEM limit: ~3/4 of physical, capped at 100 MiB."""
    default = 32 * 1024 * 1024
    try:
        cap = getattr(pltpu.get_tpu_info(), "vmem_capacity_bytes", None)
        if cap:
            return int(min(max(cap * 3 // 4, default), 100 * 1024 * 1024))
    except Exception:
        pass
    return default


# ---------------------------------------------------------------------------
# KA: fused bilinear upsample + Conv2d + per-batch BN moment partials
# ---------------------------------------------------------------------------
def _fused_upconv_kernel(x_ref, whs_ref, wwc_ref, wband_ref, y_ref, s_ref, *, k):
    # x_ref:     (1, H, W*Cin)            one batch element, NHWC flat on (W,C)
    # whs_ref:   (k, Hout, H)             k H-shifted (zero-padded) interp mats
    # wwc_ref:   (W*Cin, Wp*Cin)          kron(ww_pad^T, I_Cin)
    # wband_ref: (k, Wp*Cin, Wout*Cout)   banded conv matrices (W shifts folded)
    # y_ref:     (1, Hout, Wout*Cout)     lane-dense conv output
    # s_ref:     (1, 2, Wout*Cout)        per-batch [sum, sum of squares]
    x = x_ref[0].astype(jnp.float32)
    wwc = wwc_ref[...]
    acc = None
    for di in range(k):  # static unroll, k == 3
        t = jnp.dot(whs_ref[di], x, preferred_element_type=jnp.float32)    # (Hout, W*Cin)
        u = jnp.dot(t, wwc, preferred_element_type=jnp.float32)            # (Hout, Wp*Cin)
        p = jnp.dot(u, wband_ref[di], preferred_element_type=jnp.float32)  # (Hout, Wout*Cout)
        acc = p if acc is None else acc + p
    y_ref[0] = acc
    s0 = jnp.sum(acc, axis=0, keepdims=True)
    s1 = jnp.sum(acc * acc, axis=0, keepdims=True)
    s_ref[0] = jnp.concatenate([s0, s1], axis=0)            # single (2, L) store


def _fused_upconv(x_flat, whs, wwc, wband):
    B, H, WC = x_flat.shape
    k, Hout, _ = whs.shape
    WpC = wwc.shape[1]
    WoC = wband.shape[2]
    kern = functools.partial(_fused_upconv_kernel, k=k)
    flops = 2 * B * k * Hout * (H * WC + WC * WpC + WpC * WoC)
    bytes_acc = 4 * (x_flat.size + whs.size + wwc.size + wband.size
                     + B * Hout * WoC + B * 2 * WoC)
    return pl.pallas_call(
        kern,
        out_shape=(jax.ShapeDtypeStruct((B, Hout, WoC), jnp.float32),
                   jax.ShapeDtypeStruct((B, 2, WoC), jnp.float32)),
        grid_spec=pltpu.PrefetchScalarGridSpec(
            num_scalar_prefetch=0,
            grid=(B,),
            in_specs=[
                pl.BlockSpec((1, H, WC), lambda b: (b, 0, 0)),
                pl.BlockSpec(whs.shape, lambda b: (0, 0, 0)),
                pl.BlockSpec(wwc.shape, lambda b: (0, 0)),
                pl.BlockSpec(wband.shape, lambda b: (0, 0, 0)),
            ],
            out_specs=[
                pl.BlockSpec((1, Hout, WoC), lambda b: (b, 0, 0)),
                pl.BlockSpec((1, 2, WoC), lambda b: (b, 0, 0)),
            ],
        ),
        compiler_params=pltpu.CompilerParams(
            dimension_semantics=("parallel",),
            vmem_limit_bytes=_vmem_limit_bytes(),
        ),
        cost_estimate=pl.CostEstimate(flops=flops, transcendentals=0,
                                      bytes_accessed=bytes_acc),
    )(x_flat, whs, wwc, wband)


# ---------------------------------------------------------------------------
# KB: BatchNorm affine + ReLU, lane-dense, row-tiled (>=2 grid steps)
# ---------------------------------------------------------------------------
def _bn_relu_kernel(y_ref, sc_ref, sh_ref, o_ref):
    o_ref[...] = jnp.maximum(y_ref[...] * sc_ref[...] + sh_ref[...],
                             0.0).astype(o_ref.dtype)


def _bn_relu(y2d, sc, sh, out_dtype, *, max_tile_rows):
    T, L = y2d.shape
    # >= 2 grid steps when possible (v7x megacore); tile rows multiple of 8.
    half = ((-(-T // 2)) + 7) // 8 * 8
    tile = max(8, min(max_tile_rows, half))
    n_tiles = pl.cdiv(T, tile)
    return pl.pallas_call(
        _bn_relu_kernel,
        out_shape=jax.ShapeDtypeStruct((T, L), out_dtype),
        grid_spec=pltpu.PrefetchScalarGridSpec(
            num_scalar_prefetch=0,
            grid=(n_tiles,),
            in_specs=[
                pl.BlockSpec((tile, L), lambda i: (i, 0)),
                pl.BlockSpec((1, L), lambda i: (0, 0)),
                pl.BlockSpec((1, L), lambda i: (0, 0)),
            ],
            out_specs=pl.BlockSpec((tile, L), lambda i: (i, 0)),
        ),
        compiler_params=pltpu.CompilerParams(
            dimension_semantics=("parallel",),
            vmem_limit_bytes=_vmem_limit_bytes(),
        ),
        cost_estimate=pl.CostEstimate(flops=3 * T * L, transcendentals=0,
                                      bytes_accessed=4 * 2 * T * L),
    )(y2d, sc, sh)


# ---------------------------------------------------------------------------
# Constants & wrapper
# ---------------------------------------------------------------------------
def _bilinear_matrix(n_in, scale, pad):
    """PyTorch bilinear (align_corners=False) row-interp matrix, with `pad`
    zero rows on each border (implements the conv's zero padding)."""
    n_out = int(n_in * scale)
    i = np.arange(n_out, dtype=np.float64)
    src = np.maximum((i + 0.5) * (float(n_in) / float(n_out)) - 0.5, 0.0)
    i0 = np.floor(src).astype(np.int64)
    frac = src - i0
    i1 = np.minimum(i0 + 1, n_in - 1)
    m = np.zeros((n_out, n_in), np.float64)
    np.add.at(m, (np.arange(n_out), i0), 1.0 - frac)
    np.add.at(m, (np.arange(n_out), i1), frac)
    if pad:
        m = np.pad(m, ((pad, pad), (0, 0)))
    return m.astype(np.float32)


def reconstruct_forward(x, conv_w_hwio, conv_b, gamma, beta, *,
                        kernel_size, scale_factor, eps=1e-5, tile_rows=4096):
    """Reconstruct forward: NCHW in -> NCHW out (training-mode BatchNorm)."""
    if x is None:
        return None
    del conv_b  # conv bias cancels exactly through train-mode BatchNorm.
    B, C_in, H, W = x.shape
    k = kernel_size
    pad = 1 if k == 3 else 0
    kh, kw, wcin, C_out = conv_w_hwio.shape
    assert (kh, kw, wcin) == (k, k, C_in)

    # Interp matrices with folded conv zero padding (host-side constants).
    wh = _bilinear_matrix(H, scale_factor, pad)          # (Hp, H)
    ww = _bilinear_matrix(W, scale_factor, pad)          # (Wp, W)
    Hp, Wp = wh.shape[0], ww.shape[0]
    Hout, Wout = Hp - k + 1, Wp - k + 1

    # k H-shifted interp slices: fold the conv's H-direction window shifts.
    whs = jnp.asarray(np.stack([wh[di:di + Hout, :] for di in range(k)]))      # (k,Hout,H)
    # W-interp on the flattened (W*Cin) lane dim, keeping channels last.
    wwc = jnp.asarray(np.kron(ww.T, np.eye(C_in, dtype=np.float32)))           # (W*Cin,Wp*Cin)
    # Banded conv matrices: W-direction window shifts + channel mixing.
    sel = np.zeros((k, Wp, Wout), np.float32)
    for dj in range(k):
        sel[dj, np.arange(Wout) + dj, np.arange(Wout)] = 1.0
    w_f32 = conv_w_hwio.astype(jnp.float32)
    wband = jnp.stack([
        sum(jnp.kron(jnp.asarray(sel[dj]), w_f32[di, dj]) for dj in range(k))
        for di in range(k)
    ])                                                                          # (k,Wp*Cin,Wout*Cout)

    # Tiny input relayout (8 KiB here); the upsampled activation and the k^2
    # im2col windows are never materialised in HBM.
    x_flat = jnp.transpose(x, (0, 2, 3, 1)).reshape(B, H, W * C_in).astype(jnp.float32)

    # KA: fused upsample + conv + per-batch moments (lane-dense output).
    y, stats = _fused_upconv(x_flat, whs, wwc, wband)

    # Train-mode BatchNorm statistics folded into one affine (scale, shift).
    M = B * Hout * Wout
    ssum = stats[:, 0, :].reshape(B, Wout, C_out).sum(axis=(0, 1))
    ssq = stats[:, 1, :].reshape(B, Wout, C_out).sum(axis=(0, 1))
    mean = ssum / M
    # TODO(synk): E[x^2]-mu^2 in f32 can cancel when |mean| >> std; a
    # Welford-style per-tile merge would be more robust.
    var = jnp.maximum(ssq / M - mean * mean, 0.0)
    scale = gamma.astype(jnp.float32) * lax.rsqrt(var + eps)
    shift = beta.astype(jnp.float32) - mean * scale
    sc = jnp.tile(scale, Wout).reshape(1, Wout * C_out)
    sh = jnp.tile(shift, Wout).reshape(1, Wout * C_out)

    # KB: BN affine + ReLU over the lane-dense activation.
    out2d = _bn_relu(y.reshape(B * Hout, Wout * C_out), sc, sh, x.dtype,
                     max_tile_rows=tile_rows)

    out = out2d.reshape(B, Hout, Wout, C_out)
    return jnp.transpose(out, (0, 3, 1, 2))              # NCHW (module contract)


if __name__ == "__main__":
    key = jax.random.PRNGKey(0)
    k1, k2, k3 = jax.random.split(key, 3)

    # Shapes consistent with Reconstruct(in_ch=4, out_ch=8, kernel=3, scale=2)
    B, C_in, H, W = 2, 4, 16, 16
    C_out, ksz, scale = 8, 3, 2
    eps = 1e-5

    x = jax.random.normal(k1, (B, C_in, H, W), dtype=jnp.float32)
    w_hwio = jax.random.normal(k2, (ksz, ksz, C_in, C_out), dtype=jnp.float32)
    w_hwio = w_hwio * (1.0 / (ksz * ksz * C_in) ** 0.5)
    conv_b = jax.random.normal(k3, (C_out,), dtype=jnp.float32) * 0.1
    gamma = jnp.ones((C_out,), dtype=jnp.float32)   # BatchNorm2d default init
    beta = jnp.zeros((C_out,), dtype=jnp.float32)

    fwd = jax.jit(functools.partial(reconstruct_forward,
                                    kernel_size=ksz, scale_factor=scale, eps=eps))
    out = jax.block_until_ready(fwd(x, w_hwio, conv_b, gamma, beta))

    # Pure-JAX reference: same interpolation matrices (they define the upsample),
    # conv WITH bias (it cancels through train-mode BN), BatchNorm, ReLU.
    pad = 1 if ksz == 3 else 0
    wh = jnp.asarray(_bilinear_matrix(H, scale, pad))
    ww = jnp.asarray(_bilinear_matrix(W, scale, pad))
    u_ref = jnp.einsum('ph,bchw,qw->bpqc', wh, x, ww)             # (B, Hp, Wp, C_in)
    conv_ref = lax.conv_general_dilated(
        u_ref, w_hwio, window_strides=(1, 1), padding='VALID',
        dimension_numbers=('NHWC', 'HWIO', 'NHWC')) + conv_b
    mean = conv_ref.mean(axis=(0, 1, 2))
    var = conv_ref.var(axis=(0, 1, 2))
    ref = jnp.maximum((conv_ref - mean) * lax.rsqrt(var + eps) * gamma + beta, 0.0)
    ref = jnp.transpose(ref, (0, 3, 1, 2))

    assert out.shape == ref.shape, f"shape mismatch {out.shape} vs {ref.shape}"
    assert jnp.allclose(out, ref, atol=1e-3, rtol=1e-3), "mismatch vs reference"

    print("KERNEL_OK")
</pallas_src>

<mosaic_0001>
module attributes {stable_mosaic.version = 11 : i64} {
  func.func @_fused_upconv_kernel(%arg0: i32, %arg1: memref<1x16x64xf32, #tpu.memory_space<vmem>>, %arg2: memref<3x32x16xf32, #tpu.memory_space<vmem>>, %arg3: memref<64x136xf32, #tpu.memory_space<vmem>>, %arg4: memref<3x136x256xf32, #tpu.memory_space<vmem>>, %arg5: memref<1x32x256xf32, #tpu.memory_space<vmem>>, %arg6: memref<1x2x256xf32, #tpu.memory_space<vmem>>) attributes {dimension_semantics = [#tpu.dimension_semantics<parallel>], iteration_bounds = array<i64: 2>, scalar_prefetch = 0 : i64, scratch_operands = 0 : i64, tpu.core_type = #tpu.core_type<tc>, window_params = [{transform_indices = @transform_0, window_bounds = array<i64: 1, 16, 64>}, {pipeline_mode = #tpu.pipeline_mode<synchronous>, transform_indices = @transform_1, window_bounds = array<i64: 3, 32, 16>}, {pipeline_mode = #tpu.pipeline_mode<synchronous>, transform_indices = @transform_2, window_bounds = array<i64: 64, 136>}, {pipeline_mode = #tpu.pipeline_mode<synchronous>, transform_indices = @transform_3, window_bounds = array<i64: 3, 136, 256>}, {transform_indices = @transform_4, window_bounds = array<i64: 1, 32, 256>}, {transform_indices = @transform_5, window_bounds = array<i64: 1, 2, 256>}]} {
    %c0 = arith.constant 0 : index
    %c0_0 = arith.constant 0 : index
    %c0_1 = arith.constant 0 : index
    %0 = vector.load %arg1[%c0, %c0_0, %c0_1] : memref<1x16x64xf32, #tpu.memory_space<vmem>>, vector<1x16x64xf32>
    %1 = vector.shape_cast %0 : vector<1x16x64xf32> to vector<16x64xf32>
    %c0_2 = arith.constant 0 : index
    %c0_3 = arith.constant 0 : index
    %2 = vector.load %arg3[%c0_2, %c0_3] : memref<64x136xf32, #tpu.memory_space<vmem>>, vector<64x136xf32>
    %c0_4 = arith.constant 0 : index
    %c0_5 = arith.constant 0 : index
    %c0_6 = arith.constant 0 : index
    %3 = vector.load %arg2[%c0_4, %c0_5, %c0_6] : memref<3x32x16xf32, #tpu.memory_space<vmem>>, vector<1x32x16xf32>
    %4 = vector.shape_cast %3 : vector<1x32x16xf32> to vector<32x16xf32>
    %cst = arith.constant dense<0.000000e+00> : vector<32x64xf32>
    %5 = tpu.matmul %4, %1, %cst {dimension_numbers = #tpu.dot_dimension_numbers<[1], [0], [0], [1], [0, 0, 1, 1], [], []>} : vector<32x16xf32>, vector<16x64xf32>, vector<32x64xf32> -> vector<32x64xf32>
    %cst_7 = arith.constant dense<0.000000e+00> : vector<32x136xf32>
    %6 = tpu.matmul %5, %2, %cst_7 {dimension_numbers = #tpu.dot_dimension_numbers<[1], [0], [0], [1], [0, 0, 1, 1], [], []>} : vector<32x64xf32>, vector<64x136xf32>, vector<32x136xf32> -> vector<32x136xf32>
    %c0_8 = arith.constant 0 : index
    %c0_9 = arith.constant 0 : index
    %c0_10 = arith.constant 0 : index
    %7 = vector.load %arg4[%c0_8, %c0_9, %c0_10] : memref<3x136x256xf32, #tpu.memory_space<vmem>>, vector<1x136x256xf32>
    %8 = vector.shape_cast %7 : vector<1x136x256xf32> to vector<136x256xf32>
    %cst_11 = arith.constant dense<0.000000e+00> : vector<32x256xf32>
    %9 = tpu.matmul %6, %8, %cst_11 {dimension_numbers = #tpu.dot_dimension_numbers<[1], [0], [0], [1], [0, 0, 1, 1], [], []>} : vector<32x136xf32>, vector<136x256xf32>, vector<32x256xf32> -> vector<32x256xf32>
    %c1 = arith.constant 1 : index
    %c0_12 = arith.constant 0 : index
    %c0_13 = arith.constant 0 : index
    %10 = vector.load %arg2[%c1, %c0_12, %c0_13] : memref<3x32x16xf32, #tpu.memory_space<vmem>>, vector<1x32x16xf32>
    %11 = vector.shape_cast %10 : vector<1x32x16xf32> to vector<32x16xf32>
    %cst_14 = arith.constant dense<0.000000e+00> : vector<32x64xf32>
    %12 = tpu.matmul %11, %1, %cst_14 {dimension_numbers = #tpu.dot_dimension_numbers<[1], [0], [0], [1], [0, 0, 1, 1], [], []>} : vector<32x16xf32>, vector<16x64xf32>, vector<32x64xf32> -> vector<32x64xf32>
    %cst_15 = arith.constant dense<0.000000e+00> : vector<32x136xf32>
    %13 = tpu.matmul %12, %2, %cst_15 {dimension_numbers = #tpu.dot_dimension_numbers<[1], [0], [0], [1], [0, 0, 1, 1], [], []>} : vector<32x64xf32>, vector<64x136xf32>, vector<32x136xf32> -> vector<32x136xf32>
    %c1_16 = arith.constant 1 : index
    %c0_17 = arith.constant 0 : index
    %c0_18 = arith.constant 0 : index
    %14 = vector.load %arg4[%c1_16, %c0_17, %c0_18] : memref<3x136x256xf32, #tpu.memory_space<vmem>>, vector<1x136x256xf32>
    %15 = vector.shape_cast %14 : vector<1x136x256xf32> to vector<136x256xf32>
    %cst_19 = arith.constant dense<0.000000e+00> : vector<32x256xf32>
    %16 = tpu.matmul %13, %15, %cst_19 {dimension_numbers = #tpu.dot_dimension_numbers<[1], [0], [0], [1], [0, 0, 1, 1], [], []>} : vector<32x136xf32>, vector<136x256xf32>, vector<32x256xf32> -> vector<32x256xf32>
    %17 = arith.addf %9, %16 : vector<32x256xf32>
    %c2 = arith.constant 2 : index
    %c0_20 = arith.constant 0 : index
    %c0_21 = arith.constant 0 : index
    %18 = vector.load %arg2[%c2, %c0_20, %c0_21] : memref<3x32x16xf32, #tpu.memory_space<vmem>>, vector<1x32x16xf32>
    %19 = vector.shape_cast %18 : vector<1x32x16xf32> to vector<32x16xf32>
    %cst_22 = arith.constant dense<0.000000e+00> : vector<32x64xf32>
    %20 = tpu.matmul %19, %1, %cst_22 {dimension_numbers = #tpu.dot_dimension_numbers<[1], [0], [0], [1], [0, 0, 1, 1], [], []>} : vector<32x16xf32>, vector<16x64xf32>, vector<32x64xf32> -> vector<32x64xf32>
    %cst_23 = arith.constant dense<0.000000e+00> : vector<32x136xf32>
    %21 = tpu.matmul %20, %2, %cst_23 {dimension_numbers = #tpu.dot_dimension_numbers<[1], [0], [0], [1], [0, 0, 1, 1], [], []>} : vector<32x64xf32>, vector<64x136xf32>, vector<32x136xf32> -> vector<32x136xf32>
    %c2_24 = arith.constant 2 : index
    %c0_25 = arith.constant 0 : index
    %c0_26 = arith.constant 0 : index
    %22 = vector.load %arg4[%c2_24, %c0_25, %c0_26] : memref<3x136x256xf32, #tpu.memory_space<vmem>>, vector<1x136x256xf32>
    %23 = vector.shape_cast %22 : vector<1x136x256xf32> to vector<136x256xf32>
    %cst_27 = arith.constant dense<0.000000e+00> : vector<32x256xf32>
    %24 = tpu.matmul %21, %23, %cst_27 {dimension_numbers = #tpu.dot_dimension_numbers<[1], [0], [0], [1], [0, 0, 1, 1], [], []>} : vector<32x136xf32>, vector<136x256xf32>, vector<32x256xf32> -> vector<32x256xf32>
    %25 = arith.addf %17, %24 : vector<32x256xf32>
    %c0_28 = arith.constant 0 : index
    %c0_29 = arith.constant 0 : index
    %c0_30 = arith.constant 0 : index
    %26 = vector.load %arg5[%c0_28, %c0_29, %c0_30] : memref<1x32x256xf32, #tpu.memory_space<vmem>>, vector<1x32x256xf32>
    %27 = vector.shape_cast %26 : vector<1x32x256xf32> to vector<32x256xf32>
    %28 = vector.shape_cast %25 : vector<32x256xf32> to vector<1x32x256xf32>
    tpu.vector_store %arg5[%c0_28, %c0_29, %c0_30], %28 {strides = array<i32>} : memref<1x32x256xf32, #tpu.memory_space<vmem>>, vector<1x32x256xf32>,
    %cst_31 = arith.constant dense<0.000000e+00> : vector<256xf32>
    %29 = vector.multi_reduction <add>, %25, %cst_31 [0] : vector<32x256xf32> to vector<256xf32>
    %30 = vector.shape_cast %29 : vector<256xf32> to vector<1x256xf32>
    %31 = arith.mulf %25, %25 : vector<32x256xf32>
    %cst_32 = arith.constant dense<0.000000e+00> : vector<256xf32>
    %32 = vector.multi_reduction <add>, %31, %cst_32 [0] : vector<32x256xf32> to vector<256xf32>
    %33 = vector.shape_cast %32 : vector<256xf32> to vector<1x256xf32>
    %34 = tpu.concatenate %30, %33 in 0 : vector<1x256xf32>, vector<1x256xf32> -> vector<2x256xf32>
    %c0_33 = arith.constant 0 : index
    %c0_34 = arith.constant 0 : index
    %c0_35 = arith.constant 0 : index
    %35 = vector.load %arg6[%c0_33, %c0_34, %c0_35] : memref<1x2x256xf32, #tpu.memory_space<vmem>>, vector<1x2x256xf32>
    %36 = vector.shape_cast %35 : vector<1x2x256xf32> to vector<2x256xf32>
    %37 = vector.shape_cast %34 : vector<2x256xf32> to vector<1x2x256xf32>
    tpu.vector_store %arg6[%c0_33, %c0_34, %c0_35], %37 {strides = array<i32>} : memref<1x2x256xf32, #tpu.memory_space<vmem>>, vector<1x2x256xf32>,
    return
  }
  func.func @transform_0(%arg0: i32) -> (i32, i32, i32) {
    %c0_i32 = arith.constant 0 : i32
    %c0_i32_0 = arith.constant 0 : i32
    %c0_i32_1 = arith.constant 0 : i32
    return %arg0, %c0_i32, %c0_i32_0 : i32, i32, i32
  }
  func.func @transform_1(%arg0: i32) -> (i32, i32, i32) {
    %c0_i32 = arith.constant 0 : i32
    %c0_i32_0 = arith.constant 0 : i32
    %c0_i32_1 = arith.constant 0 : i32
    %c0_i32_2 = arith.constant 0 : i32
    return %c0_i32, %c0_i32_0, %c0_i32_1 : i32, i32, i32
  }
  func.func @transform_2(%arg0: i32) -> (i32, i32) {
    %c0_i32 = arith.constant 0 : i32
    %c0_i32_0 = arith.constant 0 : i32
    %c0_i32_1 = arith.constant 0 : i32
    return %c0_i32, %c0_i32_0 : i32, i32
  }
  func.func @transform_3(%arg0: i32) -> (i32, i32, i32) {
    %c0_i32 = arith.constant 0 : i32
    %c0_i32_0 = arith.constant 0 : i32
    %c0_i32_1 = arith.constant 0 : i32
    %c0_i32_2 = arith.constant 0 : i32
    return %c0_i32, %c0_i32_0, %c0_i32_1 : i32, i32, i32
  }
  func.func @transform_4(%arg0: i32) -> (i32, i32, i32) {
    %c0_i32 = arith.constant 0 : i32
    %c0_i32_0 = arith.constant 0 : i32
    %c0_i32_1 = arith.constant 0 : i32
    return %arg0, %c0_i32, %c0_i32_0 : i32, i32, i32
  }
  func.func @transform_5(%arg0: i32) -> (i32, i32, i32) {
    %c0_i32 = arith.constant 0 : i32
    %c0_i32_0 = arith.constant 0 : i32
    %c0_i32_1 = arith.constant 0 : i32
    return %arg0, %c0_i32, %c0_i32_0 : i32, i32, i32
  }
}

module attributes {stable_mosaic.version = 11 : i64} {
  func.func @_bn_relu_kernel(%arg0: i32, %arg1: memref<32x256xf32, #tpu.memory_space<vmem>>, %arg2: memref<1x256xf32, #tpu.memory_space<vmem>>, %arg3: memref<1x256xf32, #tpu.memory_space<vmem>>, %arg4: memref<32x256xf32, #tpu.memory_space<vmem>>) attributes {dimension_semantics = [#tpu.dimension_semantics<parallel>], iteration_bounds = array<i64: 2>, scalar_prefetch = 0 : i64, scratch_operands = 0 : i64, tpu.core_type = #tpu.core_type<tc>, window_params = [{transform_indices = @transform_0, window_bounds = array<i64: 32, 256>}, {pipeline_mode = #tpu.pipeline_mode<synchronous>, transform_indices = @transform_1, window_bounds = array<i64: 1, 256>}, {pipeline_mode = #tpu.pipeline_mode<synchronous>, transform_indices = @transform_2, window_bounds = array<i64: 1, 256>}, {transform_indices = @transform_3, window_bounds = array<i64: 32, 256>}]} {
    %c0 = arith.constant 0 : index
    %c0_0 = arith.constant 0 : index
    %0 = vector.load %arg1[%c0, %c0_0] : memref<32x256xf32, #tpu.memory_space<vmem>>, vector<32x256xf32>
    %c0_1 = arith.constant 0 : index
    %c0_2 = arith.constant 0 : index
    %1 = vector.load %arg2[%c0_1, %c0_2] : memref<1x256xf32, #tpu.memory_space<vmem>>, vector<1x256xf32>
    %2 = vector.broadcast %1 : vector<1x256xf32> to vector<32x256xf32>
    %3 = arith.mulf %0, %2 : vector<32x256xf32>
    %c0_3 = arith.constant 0 : index
    %c0_4 = arith.constant 0 : index
    %4 = vector.load %arg3[%c0_3, %c0_4] : memref<1x256xf32, #tpu.memory_space<vmem>>, vector<1x256xf32>
    %5 = vector.broadcast %4 : vector<1x256xf32> to vector<32x256xf32>
    %6 = arith.addf %3, %5 : vector<32x256xf32>
    %cst = arith.constant 0.000000e+00 : f32
    %7 = vector.broadcast %cst : f32 to vector<32x256xf32>
    %8 = arith.maximumf %6, %7 : vector<32x256xf32>
    %c0_5 = arith.constant 0 : index
    %c0_6 = arith.constant 0 : index
    %9 = vector.load %arg4[%c0_5, %c0_6] : memref<32x256xf32, #tpu.memory_space<vmem>>, vector<32x256xf32>
    tpu.vector_store %arg4[%c0_5, %c0_6], %8 {strides = array<i32>} : memref<32x256xf32, #tpu.memory_space<vmem>>, vector<32x256xf32>,
    return
  }
  func.func @transform_0(%arg0: i32) -> (i32, i32) {
    %c0_i32 = arith.constant 0 : i32
    %c0_i32_0 = arith.constant 0 : i32
    return %arg0, %c0_i32 : i32, i32
  }
  func.func @transform_1(%arg0: i32) -> (i32, i32) {
    %c0_i32 = arith.constant 0 : i32
    %c0_i32_0 = arith.constant 0 : i32
    %c0_i32_1 = arith.constant 0 : i32
    return %c0_i32, %c0_i32_0 : i32, i32
  }
  func.func @transform_2(%arg0: i32) -> (i32, i32) {
    %c0_i32 = arith.constant 0 : i32
    %c0_i32_0 = arith.constant 0 : i32
    %c0_i32_1 = arith.constant 0 : i32
    return %c0_i32, %c0_i32_0 : i32, i32
  }
  func.func @transform_3(%arg0: i32) -> (i32, i32) {
    %c0_i32 = arith.constant 0 : i32
    %c0_i32_0 = arith.constant 0 : i32
    return %arg0, %c0_i32 : i32, i32
  }
}

</mosaic_0001>

<bundles_post_ra>
// kernel: tile.13
= control target key start
LH: loop header
LB: loop body
LE: loop exit
PB: predicated region body
PF: predicated region fallthrough
CT: control target
= control target key end

     0   :  { %s40_s0 = inlined_call_operand.vmem [shape: f32[8], index: 0, kind: input, shape index: {}]   ;;  %s41_s1 = inlined_call_operand.vmem [shape: f32[32,8], index: 1, kind: output, shape index: {}]  }
   0x1   :  { %v4_v0 = vld [vmem:[%s40_s0] ss:$0 sm:$0xff] }
   0x2   :  { %5 = vst [vmem:[%s41_s1] sm:$0xff] %v4_v0 }
   0x3   :  { %12 = vst [vmem:[%s41_s1 + $0x8] sm:$0xff] %v4_v0 }
   0x4   :  { %13 = vst [vmem:[%s41_s1 + $0x10] sm:$0xff] %v4_v0 }
   0x5   :  { %14 = vst [vmem:[%s41_s1 + $0x18] sm:$0xff] %v4_v0 }

// kernel: tile.14
= control target key start
LH: loop header
LB: loop body
LE: loop exit
PB: predicated region body
PF: predicated region fallthrough
CT: control target
= control target key end

     0   :  { %s7_s6 = smov 3  ;;  %s21_s9 = smov 3  ;;  %vm4_vm0 = vcmask 64512   ;;  %vm11_vm1 = vcmask 1048512   ;;  %vm18_vm2 = vcmask 982912   ;;  %vm25_vm3 = vcmask 917312   ;;  %s233_s0 = inlined_call_operand.vmem [shape: f32[32,8], index: 0, kind: input, shape index: {}]   ;;  %s234_s1 = inlined_call_operand.vmem [shape: f32[1,256], index: 1, kind: output, shape index: {}]  }
   0x1   :  { %v123_v0 = vld [vmem:[%s233_s0 + $0xf] ss:$16 sm:%s7_s6]   ;;  %s154_s10 = smov 120   ;;  %v125_v1 = vld [vmem:[%s233_s0 + $0xd] ss:$16 sm:%s21_s9]   ;;  %s155_s13 = smov 104  }
   0x2   :  { %9 = vrot.lane.b32.xlu0 %v123_v0, %s154_s10  ;;  %23 = vrot.lane.b32.xlu1 %v125_v1, %s155_s13  ;;  %s14_s14 = smov 3  ;;  %s28_s15 = smov 3  ;;  %vm32_vm4 = vcmask 851712   ;;  %vm39_vm5 = vcmask 786112   ;;  %vm46_vm6 = vcmask 720512   ;;  %vm53_vm7 = vcmask 654912  }
   0x3   :  { %v124_v2 = vld [vmem:[%s233_s0 + $0xe] ss:$16 sm:%s14_s14]   ;;  %v126_v3 = vld [vmem:[%s233_s0 + $0xc] ss:$16 sm:%s28_s15]   ;;  %s35_s20 = smov 3  ;;  %s156_s23 = smov 112  }
   0x4   :  { %v127_v4 = vld [vmem:[%s233_s0 + $0xb] ss:$16 sm:%s35_s20]   ;;  %s157_s24 = smov 88   ;;  %s158_s25 = smov 96   ;;  %vm60_vm8 = vcmask 589312   ;;  %vm67_vm9 = vcmask 523712  }
   0x5   :  { %37 = vrot.lane.b32.xlu2 %v127_v4, %s157_s24  ;;  %s49_s26 = smov 3  ;;  %s42_s27 = smov 3  ;;  %vm74_vm10 = vcmask 458112   ;;  %vm81_vm11 = vcmask 392512   ;;  %vm88_vm12 = vcmask 326912   ;;  %vm95_vm13 = vcmask 261312  }
   0x6   :  { %s56_s28 = smov 3  ;;  %v129_v5 = vld [vmem:[%s233_s0 + $0x9] ss:$16 sm:%s49_s26]   ;;  %v128_v6 = vld [vmem:[%s233_s0 + $0xa] ss:$16 sm:%s42_s27]   ;;  %s159_s6 = smov 72  }
   0x7   :  { %v130_v7 = vld [vmem:[%s233_s0 + $0x8] ss:$16 sm:%s56_s28]   ;;  %s160_s7 = smov 80   ;;  %s161_s8 = smov 64   ;;  %vm102_vm14 = vcmask 195712   ;;  %vm109_vm15 = vcmask 130112  }
   0x8   :  { %s70_s9 = smov 3  ;;  %s63_s10 = smov 3 }
   0x9   :  { %s77_s11 = smov 3  ;;  %v132_v8 = vld [vmem:[%s233_s0 + $0x6] ss:$16 sm:%s70_s9]   ;;  %v131_v9 = vld [vmem:[%s233_s0 + $0x7] ss:$16 sm:%s63_s10]   ;;  %s162_s18 = smov 48  }
   0xa   :  { %16 = vrot.lane.b32.xlu0 %v124_v2, %s156_s23  ;;  %30 = vrot.lane.b32.xlu1 %v126_v3, %s158_s25  ;;  %v133_v10 = vld [vmem:[%s233_s0 + $0x5] ss:$16 sm:%s77_s11]   ;;  %s163_s19 = smov 56   ;;  %s164_s20 = smov 40  }
   0xb   :  { %s91_s21 = smov 3  ;;  %s84_s22 = smov 3 }
   0xc   :  { %s98_s23 = smov 3  ;;  %v135_v11 = vld [vmem:[%s233_s0 + $0x3] ss:$16 sm:%s91_s21]   ;;  %v134_v12 = vld [vmem:[%s233_s0 + $0x4] ss:$16 sm:%s84_s22]   ;;  %s165_s30 = smov 24  }
   0xd   :  { %44 = vrot.lane.b32.xlu2 %v128_v6, %s160_s7  ;;  %v136_v13 = vld [vmem:[%s233_s0 + $0x2] ss:$16 sm:%s98_s23]   ;;  %s166_s2 = smov 32   ;;  %s167_s3 = smov 16  }
   0xe   :  { %s105_s4 = smov 3  ;;  %s168_s7 = smov 8  }
   0xf   :  { %v137_v14 = vld [vmem:[%s233_s0 + $0x1] ss:$16 sm:%s105_s4]  }
  0x12   :  { %51 = vrot.lane.b32.xlu0 %v129_v5, %s159_s6  ;;  %58 = vrot.lane.b32.xlu1 %v130_v7, %s161_s8  ;;  %s2_s8 = smov 3 }
  0x13   :  { %v3_v15 = vld [vmem:[%s233_s0] ss:$16 sm:%s2_s8]  }
  0x14   :  { %5 = vst.msk [vmem:[#allocation0] ss:$8 sm:$0x3] %vm4_vm0, %v3_v15  }
  0x15   :  { %65 = vrot.lane.b32.xlu2 %v131_v9, %s163_s19 }
  0x1a   :  { %72 = vrot.lane.b32.xlu0 %v132_v8, %s162_s18  ;;  %79 = vrot.lane.b32.xlu1 %v133_v10, %s164_s20 }
  0x1d   :  { %86 = vrot.lane.b32.xlu2 %v134_v12, %s166_s2 }
  0x22   :  { %93 = vrot.lane.b32.xlu0 %v135_v11, %s165_s30  ;;  %100 = vrot.lane.b32.xlu1 %v136_v13, %s167_s3 }
  0x25   :  { %107 = vrot.lane.b32.xlu2 %v137_v14, %s168_s7 }
  0x5f   :  { %v38_v16 = vpop.permute.xlu2 %37  }
  0x67   :  { %v45_v17 = vpop.permute.xlu2 %44  }
  0x6f   :  { %v66_v19 = vpop.permute.xlu2 %65  }
  0x74   :  { %v10_v18 = vpop.permute.xlu0 %9   ;;  %v24_v20 = vpop.permute.xlu1 %23  }
  0x75   :  { %12 = vst.msk [vmem:[#allocation0] ss:$8 sm:$0x3] %vm11_vm1, %v10_v18  }
  0x77   :  { %v87_v22 = vpop.permute.xlu2 %86  }
  0x7c   :  { %v17_v21 = vpop.permute.xlu0 %16   ;;  %v31_v23 = vpop.permute.xlu1 %30  }
  0x7d   :  { %19 = vst.msk [vmem:[#allocation0] ss:$8 sm:$0x3] %vm18_vm2, %v17_v21  }
  0x7e   :  { %26 = vst.msk [vmem:[#allocation0] ss:$8 sm:$0x3] %vm25_vm3, %v24_v20  }
  0x7f   :  { %33 = vst.msk [vmem:[#allocation0] ss:$8 sm:$0x3] %vm32_vm4, %v31_v23   ;;  %v108_v25 = vpop.permute.xlu2 %107  }
  0x80   :  { %40 = vst.msk [vmem:[#allocation0] ss:$8 sm:$0x3] %vm39_vm5, %v38_v16  }
  0x81   :  { %47 = vst.msk [vmem:[#allocation0] ss:$8 sm:$0x3] %vm46_vm6, %v45_v17  }
  0x84   :  { %v52_v24 = vpop.permute.xlu0 %51   ;;  %v59_v26 = vpop.permute.xlu1 %58  }
  0x85   :  { %54 = vst.msk [vmem:[#allocation0] ss:$8 sm:$0x3] %vm53_vm7, %v52_v24  }
  0x86   :  { %61 = vst.msk [vmem:[#allocation0] ss:$8 sm:$0x3] %vm60_vm8, %v59_v26  }
  0x87   :  { %68 = vst.msk [vmem:[#allocation0] ss:$8 sm:$0x3] %vm67_vm9, %v66_v19  }
  0x8c   :  { %v73_v27 = vpop.permute.xlu0 %72   ;;  %v80_v28 = vpop.permute.xlu1 %79  }
  0x8d   :  { %75 = vst.msk [vmem:[#allocation0] ss:$8 sm:$0x3] %vm74_vm10, %v73_v27  }
  0x8e   :  { %82 = vst.msk [vmem:[#allocation0] ss:$8 sm:$0x3] %vm81_vm11, %v80_v28  }
  0x8f   :  { %89 = vst.msk [vmem:[#allocation0] ss:$8 sm:$0x3] %vm88_vm12, %v87_v22  }
  0x94   :  { %v94_v29 = vpop.permute.xlu0 %93   ;;  %v101_v30 = vpop.permute.xlu1 %100  }
  0x95   :  { %96 = vst.msk [vmem:[#allocation0] ss:$8 sm:$0x3] %vm95_vm13, %v94_v29  }
  0x96   :  { %103 = vst.msk [vmem:[#allocation0] ss:$8 sm:$0x3] %vm102_vm14, %v101_v30  }
  0x97   :  { %110 = vst.msk [vmem:[#allocation0] ss:$8 sm:$0x3] %vm109_vm15, %v108_v25  }
  0x9e   :  { %v113_v31 = vld [vmem:[#allocation0] sm:$0x1]  ;;  %v118_v32 = vld [vmem:[#allocation0 + $0x8] sm:$0x1] }
  0x9f   :  { %116 = vst [vmem:[%s234_s1] sm:$0x1] %v113_v31 }
  0xa0   :  { %138 = vst [vmem:[%s234_s1 + $0x1] sm:$0x1] %v118_v32 }

// kernel: reconstruct_forward.3
= control target key start
LH: loop header
LB: loop body
LE: loop exit
PB: predicated region body
PF: predicated region fallthrough
CT: control target
= control target key end

     0   :  { %s340_s12 = smov 0   ;;  %s363_s0 = inlined_call_operand.vmem [shape: f32[64,256], index: 0, kind: input, shape index: {}]   ;;  %s364_s1 = inlined_call_operand.vmem [shape: f32[1,256], index: 1, kind: input, shape index: {}]   ;;  %s365_s2 = inlined_call_operand.vmem [shape: f32[1,256], index: 2, kind: input, shape index: {}]   ;;  %s366_s3 = inlined_call_operand.vmem [shape: f32[64,256], index: 3, kind: output, shape index: {}]  }
   0x1 LB: > { %s289_s13 = sadd.s32 4294967295, %s318_s12   ;;  %p293_p0 = scmp.ge.s32.totalorder %s318_s12, 1  ;;  %s318_s12 = sphi %s340_s12, %s13_s12  }
   0x2   : > { %p139_p1 = scmp.lt.s32.totalorder %s318_s12, 3 }
   0x4   : > { %p140_p2 = pnand %p293_p0, %p139_p1 }
   0x5   : > { %s294_s14 = sshll.u32 (!%p140_p2), %s289_s13, 2 }
   0x6   : > { %143 = sbr.rel (%p140_p2) target bundleno = 29 (0x1d), region = 32  ;;  %p166_p3 = scmp.lt.s32.totalorder (!%p140_p2), %s294_s14, 7 }
   0xb   : > { %v187_v0 = vld [vmem:[%s364_s1] sm:$0x3]  ;;  %s368_s14 = smov (!%p166_p3, %s294_s14), 7 }
   0xc   : > { %v201_v1 = vld [vmem:[%s365_s2] sm:$0x3]  ;;  %v189_v2 = vperm.slane %v187_v0, 0  ;;  %v190_v3 = vperm.slane %v187_v0, 1  ;;  %s302_s19 = sshll.u32 %s368_s14, 4 }
   0xd   : > { %s170_s22 = scalar_lea.vmem %s363_s0, %s302_s19  ;;  %v203_v4 = vperm.slane %v201_v1, 0  ;;  %v204_v5 = vperm.slane %v201_v1, 1  ;;  %s177_s25 = scalar_lea.vmem %s366_s3, %s302_s19 }
   0xe   : > { %v179_v6 = vld [vmem:[%s170_s22] sm:$0xff]  ;;  %v180_v7 = vld [vmem:[%s170_s22 + $0x8] sm:$0xff]  ;;  %v181_v8 = vld [vmem:[%s170_s22 + $0x10] sm:$0xff] }
   0xf   : > { %v193_v9 = vmul.f32 %v189_v2, %v179_v6  ;;  %v194_v10 = vmul.f32 %v190_v3, %v180_v7  ;;  %v195_v11 = vmul.f32 %v189_v2, %v181_v8  ;;  %v182_v12 = vld [vmem:[%s170_s22 + $0x18] sm:$0xff]  ;;  %v183_v13 = vld [vmem:[%s170_s22 + $0x20] sm:$0xff]  ;;  %v184_v14 = vld [vmem:[%s170_s22 + $0x28] sm:$0xff] }
  0x10   : > { %v196_v15 = vmul.f32 %v190_v3, %v182_v12  ;;  %v197_v16 = vmul.f32 %v189_v2, %v183_v13  ;;  %v198_v17 = vmul.f32 %v190_v3, %v184_v14  ;;  %v185_v18 = vld [vmem:[%s170_s22 + $0x30] sm:$0xff]  ;;  %v186_v19 = vld [vmem:[%s170_s22 + $0x38] sm:$0xff] }
  0x11   : > { %v207_v20 = vadd.f32 %v203_v4, %v193_v9  ;;  %v208_v21 = vadd.f32 %v204_v5, %v194_v10  ;;  %v209_v22 = vadd.f32 %v203_v4, %v195_v11  ;;  %v199_v23 = vmul.f32 %v189_v2, %v185_v18 }
  0x12   : > { %v210_v24 = vadd.f32 %v204_v5, %v196_v15  ;;  %v211_v25 = vadd.f32 %v203_v4, %v197_v16  ;;  %v212_v26 = vadd.f32 %v204_v5, %v198_v17  ;;  %v200_v27 = vmul.f32 %v190_v3, %v186_v19 }
  0x13   : > { %v215_v28 = vmax.f32 %v207_v20, 0.0  ;;  %v216_v29 = vmax.f32 %v208_v21, 0.0  ;;  %v217_v30 = vmax.f32 %v209_v22, 0.0  ;;  %v213_v31 = vadd.f32 %v203_v4, %v199_v23 }
  0x14   : > { %v218_v32 = vmax.f32 %v210_v24, 0.0  ;;  %v214_v33 = vadd.f32 %v204_v5, %v200_v27  ;;  %v219_v34 = vmax.f32 %v211_v25, 0.0  ;;  %v220_v35 = vmax.f32 %v212_v26, 0.0 }
  0x15   : > { %223 = vst [vmem:[%s177_s25] sm:$0xff] %v215_v28  ;;  %v221_v36 = vmax.f32 %v213_v31, 0.0 }
  0x16   : > { %224 = vst [vmem:[%s177_s25 + $0x8] sm:$0xff] %v216_v29  ;;  %v222_v37 = vmax.f32 %v214_v33, 0.0 }
  0x17   : > { %225 = vst [vmem:[%s177_s25 + $0x10] sm:$0xff] %v217_v30 }
  0x18   : > { %226 = vst [vmem:[%s177_s25 + $0x18] sm:$0xff] %v218_v32 }
  0x19   : > { %227 = vst [vmem:[%s177_s25 + $0x20] sm:$0xff] %v219_v34 }
  0x1a   : > { %228 = vst [vmem:[%s177_s25 + $0x28] sm:$0xff] %v220_v35 }
  0x1b   : > { %229 = vst [vmem:[%s177_s25 + $0x30] sm:$0xff] %v221_v36 }
  0x1c   : > { %230 = vst [vmem:[%s177_s25 + $0x38] sm:$0xff] %v222_v37 }
  0x1d PF: > { %s13_s12 = sadd.s32 1, %s318_s12  }
  0x1e   : > { %p10_p4 = scmp.ge.s32.totalorder %s13_s12, 4  }
  0x20   :  { %12 = sbr.rel (!%p10_p4) target bundleno = 1 (0x1), region = 62 }

// kernel: reconstruct_forward.2
= control target key start
LH: loop header
LB: loop body
LE: loop exit
PB: predicated region body
PF: predicated region fallthrough
CT: control target
= control target key end

     0   :  { %s1452_s18 = smov 0   ;;  %s2059_s0 = inlined_call_operand.vmem [shape: f32[2,16,64], index: 0, kind: input, shape index: {}]   ;;  %s2060_s1 = inlined_call_operand.vmem [shape: f32[3,32,16], index: 1, kind: input, shape index: {}]   ;;  %s2061_s2 = inlined_call_operand.vmem [shape: f32[64,136], index: 2, kind: input, shape index: {}]   ;;  %s2062_s3 = inlined_call_operand.vmem [shape: f32[3,136,256], index: 3, kind: input, shape index: {}]   ;;  %s2063_s4 = inlined_call_operand.vmem [shape: f32[2,32,256], index: 4, kind: output, shape index: {0}]   ;;  %s2064_s5 = inlined_call_operand.vmem [shape: f32[2,2,256], index: 5, kind: output, shape index: {1}]  }
   0x1 LB: > { %s1252_s19 = sadd.s32 4294967295, %s1420_s18   ;;  %p1256_p0 = scmp.ge.s32.totalorder %s1420_s18, 1  ;;  %s1420_s18 = sphi %s1452_s18, %s16_s18  }
   0x2   : > { %p190_p1 = scmp.lt.s32.totalorder %s1420_s18, 3 }
   0x4   : > { %p191_p2 = pnand %p1256_p0, %p190_p1 }
   0x5   : > { %p223_p3 = scmp.lt.s32.totalorder (!%p191_p2), %s1252_s19, 1 }
   0x6   : > { %194 = sbr.rel (%p191_p2) target bundleno = 795 (0x31b), region = 36 }
   0xb   : > { %s2066_s19 = smov (!%p223_p3, %s1252_s19), 1  ;;  %v256_v2 = vld [vmem:[%s2060_s1] sm:$0xff]  ;;  %vm260_vm0 = vcmask 130048   ;;  %v258_v3 = vld [vmem:[%s2060_s1 + $0x10] sm:$0xff]  ;;  %v257_v4 = vld [vmem:[%s2060_s1 + $0x8] sm:$0xff]  ;;  %vm302_vm1 = vcmask 523264  }
   0xc   : > { %s1401_s20 = sshll.u32 %s2066_s19, 4  ;;  %v259_v5 = vld [vmem:[%s2060_s1 + $0x18] sm:$0xff]  ;;  %v1495_v6 = vld [vmem:[%s2061_s2 + $0x70] sm:$0xff]  ;;  %v1505_v8 = vld [vmem:[%s2061_s2 + $0x60] sm:$0xff]  ;;  %vm558_vm2 = vcmask 64512   ;;  %s1402_s6 = sshll.u32 %s2066_s19, 6 }
   0xd   : > { %s227_s23 = scalar_lea.vmem %s2059_s0, %s1401_s20  ;;  %v1500_v7 = vld [vmem:[%s2061_s2 + $0x78] sm:$0xff]  ;;  %323 = vmatpush.msra.mxu1 %v1495_v6  ;;  %v1512_v9 = vld [vmem:[%s2061_s2 + $0x68] sm:$0xff]  ;;  %v1517_v10 = vld [vmem:[%s2061_s2 + $0x50] sm:$0xff]  ;;  %s2033_s9 = scalar_lea.vmem %s2063_s4, %s1402_s6  ;;  %vm1154_vm3 = vcmask 1040384   ;;  %vm1160_vm4 = vcmask 1041408  }
   0xe   : > { %v1466_v0 = vld [vmem:[%s227_s23 + $0x8] sm:$0xff]  ;;  %v1468_v1 = vld [vmem:[%s227_s23] sm:$0xff]  ;;  %352 = vmatpush.msra.mxu2 %v1500_v7  ;;  %v1522_v11 = vld [vmem:[%s2061_s2 + $0x58] sm:$0xff]  ;;  %s1403_s10 = sshll.u32 %s2066_s19, 2 }
   0xf   : > { %287 = vmatpush.msra.mxu0 %v1466_v0  ;;  %1404 = vmatpush.msra.mxu3 %v1466_v0  ;;  %v1531_v12 = vld [vmem:[%s2061_s2 + $0x40] sm:$0xff]  ;;  %v1536_v13 = vld [vmem:[%s2061_s2 + $0x48] sm:$0xff]  ;;  %v1548_v15 = vld [vmem:[%s2061_s2 + $0x30] sm:$0xff]  ;;  %s237_s13 = scalar_lea.vmem %s2064_s5, %s1403_s10 }
  0x10   : > { %324 = vmatpush.msra.mxu1 %v1505_v8  ;;  %353 = vmatpush.msra.mxu2 %v1512_v9  ;;  %v1275_v14 = vld [vmem:[%s2060_s1 + $0x20] sm:$0xff]  ;;  %v1553_v16 = vld [vmem:[%s2061_s2 + $0x38] sm:$0xff]  ;;  %v1568_v18 = vld [vmem:[%s2061_s2 + $0x28] sm:$0xff] }
  0x11   : > { %288 = vmatpush.msra.mxu0 %v1468_v1  ;;  %1405 = vmatpush.msra.mxu3 %v1468_v1  ;;  %v1563_v17 = vld [vmem:[%s2061_s2 + $0x20] sm:$0xff]  ;;  %v1576_v19 = vld [vmem:[%s2061_s2 + $0x10] sm:$0xff]  ;;  %v1581_v20 = vld [vmem:[%s2061_s2 + $0x18] sm:$0xff] }
  0x12   : > { %1263 = vmatmul.msk.f32.vlgmr.msra.gmra.mxu0 %vm260_vm0, %v256_v2  ;;  %1265 = vmatmul.msk.f32.vlgmr.msra.gmra.mxu3 %vm260_vm0, %v258_v3  ;;  %v1276_v21 = vld [vmem:[%s2060_s1 + $0x28] sm:$0xff]  ;;  %v1277_v22 = vld [vmem:[%s2060_s1 + $0x30] sm:$0xff]  ;;  %v1278_v23 = vld [vmem:[%s2060_s1 + $0x38] sm:$0xff] }
  0x13   : > { %438 = vmatpush.msrb.mxu3 %v1466_v0  ;;  %473 = vmatpush.msrb.mxu0 %v1495_v6  ;;  %v1609_v24 = vld [vmem:[%s2061_s2] sm:$0xff]  ;;  %v1614_v25 = vld [vmem:[%s2061_s2 + $0x8] sm:$0xff]  ;;  %v1319_v32 = vld [vmem:[%s2062_s3 + $0x1f0] sm:$0xff] }
  0x14   : > { %325 = vmatpush.msra.mxu1 %v1517_v10  ;;  %354 = vmatpush.msra.mxu2 %v1522_v11  ;;  %v1321_v30 = vld [vmem:[%s2062_s3 + $0x200] sm:$0xff]  ;;  %v1322_v31 = vld [vmem:[%s2062_s3 + $0x208] sm:$0xff]  ;;  %v1320_v33 = vld [vmem:[%s2062_s3 + $0x1f8] sm:$0xff] }
  0x15   : > { %439 = vmatpush.msrb.mxu3 %v1468_v1  ;;  %474 = vmatpush.msrb.mxu0 %v1505_v8  ;;  %v1317_v34 = vld [vmem:[%s2062_s3 + $0x1e0] sm:$0xff]  ;;  %v1318_v35 = vld [vmem:[%s2062_s3 + $0x1e8] sm:$0xff]  ;;  %v1315_v36 = vld [vmem:[%s2062_s3 + $0x1d0] sm:$0xff] }
  0x16   : > { %326 = vmatpush.msra.mxu1 %v1531_v12  ;;  %355 = vmatpush.msra.mxu2 %v1536_v13  ;;  %v1316_v37 = vld [vmem:[%s2062_s3 + $0x1d8] sm:$0xff]  ;;  %v1313_v38 = vld [vmem:[%s2062_s3 + $0x1c0] sm:$0xff]  ;;  %v1314_v43 = vld [vmem:[%s2062_s3 + $0x1c8] sm:$0xff] }
  0x17   : > { %502 = vmatpush.msra.mxu3 %v1500_v7  ;;  %475 = vmatpush.msrb.mxu0 %v1517_v10  ;;  %v1311_v44 = vld [vmem:[%s2062_s3 + $0x1b0] sm:$0xff]  ;;  %v1312_v45 = vld [vmem:[%s2062_s3 + $0x1b8] sm:$0xff]  ;;  %v1309_v46 = vld [vmem:[%s2062_s3 + $0x1a0] sm:$0xff] }
  0x18   : > { %327 = vmatpush.msra.mxu1 %v1548_v15  ;;  %356 = vmatpush.msra.mxu2 %v1553_v16  ;;  %v1310_v47 = vld [vmem:[%s2062_s3 + $0x1a8] sm:$0xff]  ;;  %v1307_v48 = vld [vmem:[%s2062_s3 + $0x190] sm:$0xff]  ;;  %v1308_v49 = vld [vmem:[%s2062_s3 + $0x198] sm:$0xff] }
  0x19   : > { %503 = vmatpush.msra.mxu3 %v1512_v9  ;;  %476 = vmatpush.msrb.mxu0 %v1531_v12  ;;  %v1305_v50 = vld [vmem:[%s2062_s3 + $0x180] sm:$0xff]  ;;  %v1306_v51 = vld [vmem:[%s2062_s3 + $0x188] sm:$0xff]  ;;  %v1303_v52 = vld [vmem:[%s2062_s3 + $0x170] sm:$0xff] }
  0x1a   : > { %1264 = vmatmul.msk.f32.gmra.mxu0 %vm260_vm0, %v257_v4  ;;  %1266 = vmatmul.msk.f32.gmra.mxu3 %vm260_vm0, %v259_v5  ;;  %v1304_v53 = vld [vmem:[%s2062_s3 + $0x178] sm:$0xff]  ;;  %v1301_v54 = vld [vmem:[%s2062_s3 + $0x160] sm:$0xff]  ;;  %v1302_v55 = vld [vmem:[%s2062_s3 + $0x168] sm:$0xff] }
  0x1b   : > { %504 = vmatpush.msra.mxu3 %v1522_v11  ;;  %477 = vmatpush.msrb.mxu0 %v1548_v15  ;;  %v1299_v56 = vld [vmem:[%s2062_s3 + $0x150] sm:$0xff]  ;;  %v1300_v57 = vld [vmem:[%s2062_s3 + $0x158] sm:$0xff]  ;;  %v1297_v58 = vld [vmem:[%s2062_s3 + $0x140] sm:$0xff] }
  0x1c   : > { %328 = vmatpush.msra.mxu1 %v1563_v17  ;;  %357 = vmatpush.msra.mxu2 %v1568_v18  ;;  %v1298_v59 = vld [vmem:[%s2062_s3 + $0x148] sm:$0xff]  ;;  %v1295_v60 = vld [vmem:[%s2062_s3 + $0x130] sm:$0xff]  ;;  %v1296_v61 = vld [vmem:[%s2062_s3 + $0x138] sm:$0xff] }
  0x1d   : > { %505 = vmatpush.msra.mxu3 %v1536_v13  ;;  %478 = vmatpush.msrb.mxu0 %v1563_v17  ;;  %v1293_v62 = vld [vmem:[%s2062_s3 + $0x120] sm:$0xff]  ;;  %v1294_v63 = vld [vmem:[%s2062_s3 + $0x128] sm:$0xff]  ;;  %v1291_v2 = vld [vmem:[%s2062_s3 + $0x110] sm:$0xff] }
  0x1e   : > { %329 = vmatpush.msra.mxu1 %v1576_v19  ;;  %358 = vmatpush.msra.mxu2 %v1581_v20  ;;  %v1292_v3 = vld [vmem:[%s2062_s3 + $0x118] sm:$0xff]  ;;  %v403_v4 = vld [vmem:[%s2062_s3 + $0xf0] sm:$0xff] }
  0x1f   : > { %506 = vmatpush.msra.mxu3 %v1553_v16  ;;  %479 = vmatpush.msrb.mxu0 %v1576_v19  ;;  %v404_v5 = vld [vmem:[%s2062_s3 + $0xf8] sm:$0xff] }
  0x20   : > { %330 = vmatpush.msra.mxu1 %v1609_v24  ;;  %359 = vmatpush.msra.mxu2 %v1614_v25 }
  0x21   : > { %507 = vmatpush.msra.mxu3 %v1568_v18  ;;  %480 = vmatpush.msrb.mxu0 %v1609_v24 }
  0x22   : > { %1279 = vmatmul.msk.f32.vlgmr.msrb.gmra.mxu3 %vm260_vm0, %v1275_v14  ;;  %571 = vmatpush.msrb.mxu1 %v1321_v30  ;;  %v401_v14 = vld [vmem:[%s2062_s3 + $0xe0] sm:$0xff]  ;;  %v395_v30 = vld [vmem:[%s2062_s3 + $0xb0] sm:$0xff] }
  0x23   : > { %508 = vmatpush.msra.mxu3 %v1581_v20  ;;  %629 = vmatpush.msra.mxu0 %v1322_v31  ;;  %v396_v31 = vld [vmem:[%s2062_s3 + $0xb8] sm:$0xff] }
  0x24   : > { %572 = vmatpush.msrb.mxu1 %v1319_v32  ;;  %v393_v32 = vld [vmem:[%s2062_s3 + $0xa0] sm:$0xff] }
  0x25   : > { %509 = vmatpush.msra.mxu3 %v1614_v25  ;;  %630 = vmatpush.msra.mxu0 %v1320_v33  ;;  %v394_v33 = vld [vmem:[%s2062_s3 + $0xa8] sm:$0xff] }
  0x26   : > { %573 = vmatpush.msrb.mxu1 %v1317_v34  ;;  %v391_v34 = vld [vmem:[%s2062_s3 + $0x90] sm:$0xff] }
  0x27   : > { %631 = vmatpush.msra.mxu0 %v1318_v35  ;;  %v392_v35 = vld [vmem:[%s2062_s3 + $0x98] sm:$0xff] }
  0x28   : > { %574 = vmatpush.msrb.mxu1 %v1315_v36  ;;  %v389_v36 = vld [vmem:[%s2062_s3 + $0x80] sm:$0xff] }
  0x29   : > { %632 = vmatpush.msra.mxu0 %v1316_v37  ;;  %v390_v37 = vld [vmem:[%s2062_s3 + $0x88] sm:$0xff] }
  0x2a   : > { %1280 = vmatmul.msk.f32.gmra.mxu3 %vm260_vm0, %v1276_v21  ;;  %575 = vmatpush.msrb.mxu1 %v1313_v38  ;;  %v402_v21 = vld [vmem:[%s2062_s3 + $0xe8] sm:$0xff]  ;;  %v387_v38 = vld [vmem:[%s2062_s3 + $0x70] sm:$0xff] }
  0x2b   : > { %633 = vmatpush.msra.mxu0 %v1314_v43  ;;  %v384_v43 = vld [vmem:[%s2062_s3 + $0x58] sm:$0xff] }
  0x2c   : > { %576 = vmatpush.msrb.mxu1 %v1311_v44  ;;  %v381_v44 = vld [vmem:[%s2062_s3 + $0x40] sm:$0xff] }
  0x2d   : > { %634 = vmatpush.msra.mxu0 %v1312_v45  ;;  %v382_v45 = vld [vmem:[%s2062_s3 + $0x48] sm:$0xff] }
  0x2e   : > { %577 = vmatpush.msrb.mxu1 %v1309_v46  ;;  %v379_v46 = vld [vmem:[%s2062_s3 + $0x30] sm:$0xff] }
  0x2f   : > { %635 = vmatpush.msra.mxu0 %v1310_v47  ;;  %v380_v47 = vld [vmem:[%s2062_s3 + $0x38] sm:$0xff] }
  0x30   : > { %578 = vmatpush.msrb.mxu1 %v1307_v48  ;;  %v377_v48 = vld [vmem:[%s2062_s3 + $0x20] sm:$0xff] }
  0x31   : > { %636 = vmatpush.msra.mxu0 %v1308_v49  ;;  %v378_v49 = vld [vmem:[%s2062_s3 + $0x28] sm:$0xff] }
  0x32   : > { %1281 = vmatmul.msk.f32.gmra.mxu3 %vm260_vm0, %v1277_v22  ;;  %579 = vmatpush.msrb.mxu1 %v1305_v50  ;;  %v399_v22 = vld [vmem:[%s2062_s3 + $0xd0] sm:$0xff] }
  0x33   : > { %637 = vmatpush.msra.mxu0 %v1306_v51  ;;  %v375_v50 = vld [vmem:[%s2062_s3 + $0x10] sm:$0xff]  ;;  %v376_v51 = vld [vmem:[%s2062_s3 + $0x18] sm:$0xff] }
  0x34   : > { %580 = vmatpush.msrb.mxu1 %v1303_v52  ;;  %v373_v52 = vld [vmem:[%s2062_s3] sm:$0xff] }
  0x35   : > { %638 = vmatpush.msra.mxu0 %v1304_v53  ;;  %v374_v53 = vld [vmem:[%s2062_s3 + $0x8] sm:$0xff] }
  0x36   : > { %581 = vmatpush.msrb.mxu1 %v1301_v54 }
  0x37   : > { %639 = vmatpush.msra.mxu0 %v1302_v55  ;;  %v405_v55 = vld [vmem:[%s2062_s3 + $0x100] sm:$0xff] }
  0x38   : > { %582 = vmatpush.msrb.mxu1 %v1299_v56  ;;  %v406_v56 = vld [vmem:[%s2062_s3 + $0x108] sm:$0xff] }
  0x39   : > { %640 = vmatpush.msra.mxu0 %v1300_v57 }
  0x3a   : > { %1282 = vmatmul.msk.f32.gmra.mxu3 %vm260_vm0, %v1278_v23  ;;  %583 = vmatpush.msrb.mxu1 %v1297_v58  ;;  %v1323_v23 = vld [vmem:[%s2062_s3 + $0x210] sm:$0xff] }
  0x3b   : > { %641 = vmatpush.msra.mxu0 %v1298_v59  ;;  %615 = vmatpush.msrb.mxu2 %v1323_v23 }
  0x3c   : > { %584 = vmatpush.msrb.mxu1 %v1295_v60 }
  0x3d   : > { %642 = vmatpush.msra.mxu0 %v1296_v61 }
  0x3e   : > { %585 = vmatpush.msrb.mxu1 %v1293_v62 }
  0x3f   : > { %643 = vmatpush.msra.mxu0 %v1294_v63 }
  0x40   : > { %586 = vmatpush.msrb.mxu1 %v1291_v2 }
  0x41   : > { %644 = vmatpush.msra.mxu0 %v1292_v3 }
  0x8f   : > { %v290_v26 = vpop.f32.mrf.mxu0 }
  0x90   : > { %1267 = vmatmul.msk.f32.vlgmr.msra.gmra.mxu1 %vm302_vm1, %v290_v26  ;;  %1271 = vmatmul.msk.f32.vlgmr.msra.gmra.mxu2 %vm302_vm1, %v290_v26  ;;  %v1324_v26 = vld [vmem:[%s2062_s3 + $0x218] sm:$0xff] }
  0x91   : > { %699 = vmatpush.msra.mxu1 %v403_v4  ;;  %673 = vmatpush.msrb.mxu3 %v1324_v26 }
  0x92   : > { %743 = vmatpush.msra.mxu2 %v405_v55  ;;  %v1385_v55 = vld [vmem:[%s2062_s3 + $0x300] sm:$0xff] }
  0x93   : > { %700 = vmatpush.msra.mxu1 %v401_v14 }
  0x95   : > { %v296_v27 = vpop.f32.mrf.mxu3  ;;  %701 = vmatpush.msra.mxu1 %v399_v22 }
  0x97   : > { %v293_v28 = vpop.f32.mrf.mxu0 }
  0x98   : > { %1268 = vmatmul.msk.f32.gmra.mxu1 %vm302_vm1, %v293_v28  ;;  %1272 = vmatmul.msk.f32.gmra.mxu2 %vm302_vm1, %v293_v28  ;;  %v397_v28 = vld [vmem:[%s2062_s3 + $0xc0] sm:$0xff] }
  0x99   : > { %702 = vmatpush.msra.mxu1 %v397_v28 }
  0x9b   : > { %703 = vmatpush.msra.mxu1 %v395_v30 }
  0x9d   : > { %v299_v29 = vpop.f32.mrf.mxu3  ;;  %704 = vmatpush.msra.mxu1 %v393_v32 }
  0x9f   : > { %705 = vmatpush.msra.mxu1 %v391_v34 }
  0xa0   : > { %1269 = vmatmul.msk.f32.gmra.mxu1 %vm302_vm1, %v296_v27  ;;  %1273 = vmatmul.msk.f32.gmra.mxu2 %vm302_vm1, %v296_v27  ;;  %v400_v27 = vld [vmem:[%s2062_s3 + $0xd8] sm:$0xff] }
  0xa1   : > { %706 = vmatpush.msra.mxu1 %v389_v36 }
  0xa3   : > { %707 = vmatpush.msra.mxu1 %v387_v38 }
  0xa5   : > { %v441_v39 = vpop.f32.mrf.mxu3 }
  0xa6   : > { %1283 = vmatmul.msk.f32.vlgmr.msrb.gmra.mxu0 %vm302_vm1, %v441_v39  ;;  %1287 = vmatmul.msk.f32.vlgmr.msra.gmra.mxu3 %vm302_vm1, %v441_v39  ;;  %v388_v39 = vld [vmem:[%s2062_s3 + $0x78] sm:$0xff] }
  0xa7   : > { %757 = vmatpush.msrb.mxu0 %v404_v5  ;;  %801 = vmatpush.msra.mxu3 %v406_v56  ;;  %v1384_v56 = vld [vmem:[%s2062_s3 + $0x2f8] sm:$0xff] }
  0xa8   : > { %1270 = vmatmul.msk.f32.gmra.mxu1 %vm302_vm1, %v299_v29  ;;  %1274 = vmatmul.msk.f32.gmra.mxu2 %vm302_vm1, %v299_v29  ;;  %v398_v29 = vld [vmem:[%s2062_s3 + $0xc8] sm:$0xff] }
  0xa9   : > { %758 = vmatpush.msrb.mxu0 %v402_v21 }
  0xab   : > { %759 = vmatpush.msrb.mxu0 %v400_v27 }
  0xad   : > { %v444_v40 = vpop.f32.mrf.mxu3  ;;  %760 = vmatpush.msrb.mxu0 %v398_v29 }
  0xae   : > { %1284 = vmatmul.msk.f32.gmra.mxu0 %vm302_vm1, %v444_v40  ;;  %1288 = vmatmul.msk.f32.gmra.mxu3 %vm302_vm1, %v444_v40  ;;  %v385_v40 = vld [vmem:[%s2062_s3 + $0x60] sm:$0xff] }
  0xaf   : > { %761 = vmatpush.msrb.mxu0 %v396_v31  ;;  %708 = vmatpush.msra.mxu1 %v385_v40 }
  0xb1   : > { %762 = vmatpush.msrb.mxu0 %v394_v33 }
  0xb3   : > { %763 = vmatpush.msrb.mxu0 %v392_v35 }
  0xb5   : > { %v447_v41 = vpop.f32.mrf.mxu3  ;;  %764 = vmatpush.msrb.mxu0 %v390_v37 }
  0xb6   : > { %1285 = vmatmul.msk.f32.gmra.mxu0 %vm302_vm1, %v447_v41  ;;  %1289 = vmatmul.msk.f32.gmra.mxu3 %vm302_vm1, %v447_v41  ;;  %v386_v41 = vld [vmem:[%s2062_s3 + $0x68] sm:$0xff] }
  0xb7   : > { %765 = vmatpush.msrb.mxu0 %v388_v39 }
  0xb9   : > { %766 = vmatpush.msrb.mxu0 %v386_v41 }
  0xbb   : > { %767 = vmatpush.msrb.mxu0 %v384_v43 }
  0xbd   : > { %v450_v42 = vpop.f32.mrf.mxu3  ;;  %768 = vmatpush.msrb.mxu0 %v382_v45 }
  0xbe   : > { %1286 = vmatmul.msk.f32.gmra.mxu0 %vm302_vm1, %v450_v42  ;;  %1290 = vmatmul.msk.f32.gmra.mxu3 %vm302_vm1, %v450_v42  ;;  %v383_v42 = vld [vmem:[%s2062_s3 + $0x50] sm:$0xff] }
  0xbf   : > { %709 = vmatpush.msra.mxu1 %v383_v42  ;;  %769 = vmatpush.msrb.mxu0 %v380_v47 }
  0xc1   : > { %710 = vmatpush.msra.mxu1 %v381_v44  ;;  %770 = vmatpush.msrb.mxu0 %v378_v49 }
  0xc3   : > { %711 = vmatpush.msra.mxu1 %v379_v46  ;;  %771 = vmatpush.msrb.mxu0 %v376_v51 }
  0xc5   : > { %712 = vmatpush.msra.mxu1 %v377_v48  ;;  %772 = vmatpush.msrb.mxu0 %v374_v53  ;;  %v1387_v53 = vld [vmem:[%s2062_s3 + $0x310] sm:$0xff] }
  0xc7   : > { %713 = vmatpush.msra.mxu1 %v375_v50 }
  0xc9   : > { %714 = vmatpush.msra.mxu1 %v373_v52  ;;  %v1388_v52 = vld [vmem:[%s2062_s3 + $0x318] sm:$0xff] }
 0x123   : > { %v482_v54 = vpop.f32.mrf.mxu0 }
 0x124   : > { %587 = vmatmul.f32.vlgmr.msrb.gmra.mxu1 %v482_v54  ;;  %645 = vmatmul.f32.vlgmr.msra.gmra.mxu0 %v482_v54  ;;  %v1386_v54 = vld [vmem:[%s2062_s3 + $0x308] sm:$0xff] }
 0x125   : > { %846 = vmatpush.msrb.mxu1 %v1466_v0  ;;  %910 = vmatpush.msra.mxu0 %v1500_v7 }
 0x127   : > { %847 = vmatpush.msrb.mxu1 %v1468_v1  ;;  %911 = vmatpush.msra.mxu0 %v1512_v9 }
 0x129   : > { %v511_v57 = vpop.f32.mrf.mxu3  ;;  %912 = vmatpush.msra.mxu0 %v1522_v11 }
 0x12a   : > { %1325 = vmatmul.msk.f32.vlgmr.msrb.gmra.mxu2 %vm558_vm2, %v511_v57  ;;  %1329 = vmatmul.msk.f32.vlgmr.msrb.gmra.mxu3 %vm558_vm2, %v511_v57  ;;  %v1383_v57 = vld [vmem:[%s2062_s3 + $0x2f0] sm:$0xff] }
 0x12b   : > { %v485_v58 = vpop.f32.mrf.mxu0  ;;  %881 = vmatpush.msrb.mxu2 %v1495_v6  ;;  %913 = vmatpush.msra.mxu0 %v1536_v13 }
 0x12c   : > { %590 = vmatmul.f32.gmra.mxu1 %v485_v58  ;;  %648 = vmatmul.f32.gmra.mxu0 %v485_v58  ;;  %v1390_v58 = vld [vmem:[%s2062_s3 + $0x328] sm:$0xff] }
 0x12d   : > { %882 = vmatpush.msrb.mxu2 %v1505_v8  ;;  %914 = vmatpush.msra.mxu0 %v1553_v16  ;;  %v332_v8 = vpop.f32.mrf.mxu1 }
 0x12e   : > { %978 = vmatpush.msrb.mxu3 %v1387_v53 }
 0x12f   : > { %883 = vmatpush.msrb.mxu2 %v1517_v10  ;;  %915 = vmatpush.msra.mxu0 %v1568_v18  ;;  %v361_v10 = vpop.f32.mrf.mxu2  ;;  %v1341_v18 = vld [vmem:[%s2060_s1 + $0x40] sm:$0xff] }
 0x130   : > { %979 = vmatpush.msrb.mxu3 %v1385_v55 }
 0x131   : > { %v514_v0 = vpop.f32.mrf.mxu3  ;;  %884 = vmatpush.msrb.mxu2 %v1531_v12  ;;  %916 = vmatpush.msra.mxu0 %v1581_v20  ;;  %v1343_v20 = vld [vmem:[%s2060_s1 + $0x50] sm:$0xff] }
 0x132   : > { %1326 = vmatmul.msk.f32.gmra.mxu2 %vm558_vm2, %v514_v0  ;;  %1330 = vmatmul.msk.f32.gmra.mxu3 %vm558_vm2, %v514_v0 }
 0x133   : > { %v488_v1 = vpop.f32.mrf.mxu0  ;;  %885 = vmatpush.msrb.mxu2 %v1548_v15  ;;  %917 = vmatpush.msra.mxu0 %v1614_v25 }
 0x134   : > { %593 = vmatmul.f32.gmra.mxu1 %v488_v1  ;;  %651 = vmatmul.f32.gmra.mxu0 %v488_v1  ;;  %v1389_v1 = vld [vmem:[%s2062_s3 + $0x320] sm:$0xff] }
 0x135   : > { %886 = vmatpush.msrb.mxu2 %v1563_v17  ;;  %v335_v11 = vpop.f32.mrf.mxu1  ;;  %980 = vmatpush.msrb.mxu3 %v1383_v57 }
 0x137   : > { %887 = vmatpush.msrb.mxu2 %v1576_v19  ;;  %v364_v12 = vpop.f32.mrf.mxu2  ;;  %v1342_v19 = vld [vmem:[%s2060_s1 + $0x48] sm:$0xff] }
 0x139   : > { %v517_v6 = vpop.f32.mrf.mxu3  ;;  %888 = vmatpush.msrb.mxu2 %v1609_v24  ;;  %v1344_v24 = vld [vmem:[%s2060_s1 + $0x58] sm:$0xff] }
 0x13a   : > { %1327 = vmatmul.msk.f32.gmra.mxu2 %vm558_vm2, %v517_v6  ;;  %1331 = vmatmul.msk.f32.gmra.mxu3 %vm558_vm2, %v517_v6 }
 0x13b   : > { %v491_v7 = vpop.f32.mrf.mxu0 }
 0x13c   : > { %596 = vmatmul.f32.gmra.mxu1 %v491_v7  ;;  %654 = vmatmul.f32.gmra.mxu0 %v491_v7  ;;  %v1382_v7 = vld [vmem:[%s2062_s3 + $0x2e8] sm:$0xff] }
 0x13d   : > { %v338_v13 = vpop.f32.mrf.mxu1 }
 0x13f   : > { %v367_v15 = vpop.f32.mrf.mxu2 }
 0x141   : > { %v520_v9 = vpop.f32.mrf.mxu3 }
 0x142   : > { %1328 = vmatmul.msk.f32.gmra.mxu2 %vm558_vm2, %v520_v9  ;;  %1332 = vmatmul.msk.f32.gmra.mxu3 %vm558_vm2, %v520_v9  ;;  %v1380_v9 = vld [vmem:[%s2062_s3 + $0x2d8] sm:$0xff] }
 0x144   : > { %715 = vmatmul.f32.vlgmr.msra.gmra.mxu1 %v332_v8  ;;  %773 = vmatmul.f32.vlgmr.msrb.gmra.mxu0 %v332_v8  ;;  %v1381_v8 = vld [vmem:[%s2062_s3 + $0x2e0] sm:$0xff] }
 0x145   : > { %v341_v16 = vpop.f32.mrf.mxu1  ;;  %1080 = vmatpush.msrb.mxu0 %v1390_v58  ;;  %1022 = vmatpush.msra.mxu1 %v1389_v1 }
 0x146   : > { %981 = vmatpush.msrb.mxu3 %v1381_v8 }
 0x147   : > { %v370_v17 = vpop.f32.mrf.mxu2 }
 0x14a   : > { %1333 = vmatmul.msk.f32.vlgmr.msra.gmra.mxu2 %vm558_vm2, %v361_v10  ;;  %1337 = vmatmul.msk.f32.vlgmr.msra.gmra.mxu3 %vm558_vm2, %v361_v10  ;;  %v1379_v10 = vld [vmem:[%s2062_s3 + $0x2d0] sm:$0xff] }
 0x14b   : > { %1036 = vmatpush.msra.mxu2 %v1388_v52  ;;  %982 = vmatpush.msrb.mxu3 %v1379_v10 }
 0x14c   : > { %718 = vmatmul.f32.gmra.mxu1 %v335_v11  ;;  %776 = vmatmul.f32.gmra.mxu0 %v335_v11 }
 0x14d   : > { %1037 = vmatpush.msra.mxu2 %v1386_v54 }
 0x14f   : > { %1038 = vmatpush.msra.mxu2 %v1384_v56 }
 0x151   : > { %1039 = vmatpush.msra.mxu2 %v1382_v7 }
 0x152   : > { %1334 = vmatmul.msk.f32.gmra.mxu2 %vm558_vm2, %v364_v12  ;;  %1338 = vmatmul.msk.f32.gmra.mxu3 %vm558_vm2, %v364_v12  ;;  %v1378_v12 = vld [vmem:[%s2062_s3 + $0x2c8] sm:$0xff] }
 0x153   : > { %1040 = vmatpush.msra.mxu2 %v1380_v9 }
 0x154   : > { %721 = vmatmul.f32.gmra.mxu1 %v338_v13  ;;  %779 = vmatmul.f32.gmra.mxu0 %v338_v13  ;;  %v1377_v13 = vld [vmem:[%s2062_s3 + $0x2c0] sm:$0xff] }
 0x155   : > { %1041 = vmatpush.msra.mxu2 %v1378_v12  ;;  %983 = vmatpush.msrb.mxu3 %v1377_v13 }
 0x15a   : > { %1335 = vmatmul.msk.f32.gmra.mxu2 %vm558_vm2, %v367_v15  ;;  %1339 = vmatmul.msk.f32.gmra.mxu3 %vm558_vm2, %v367_v15  ;;  %v1376_v15 = vld [vmem:[%s2062_s3 + $0x2b8] sm:$0xff] }
 0x15b   : > { %1042 = vmatpush.msra.mxu2 %v1376_v15 }
 0x15c   : > { %724 = vmatmul.f32.gmra.mxu1 %v341_v16  ;;  %782 = vmatmul.f32.gmra.mxu0 %v341_v16  ;;  %v1375_v16 = vld [vmem:[%s2062_s3 + $0x2b0] sm:$0xff] }
 0x15d   : > { %984 = vmatpush.msrb.mxu3 %v1375_v16 }
 0x162   : > { %1336 = vmatmul.msk.f32.gmra.mxu2 %vm558_vm2, %v370_v17  ;;  %1340 = vmatmul.msk.f32.gmra.mxu3 %vm558_vm2, %v370_v17  ;;  %v1374_v17 = vld [vmem:[%s2062_s3 + $0x2a8] sm:$0xff] }
 0x163   : > { %1043 = vmatpush.msra.mxu2 %v1374_v17 }
 0x164   : > { %1345 = vmatmul.msk.f32.vlgmr.msrb.gmra.mxu1 %vm260_vm0, %v1341_v18  ;;  %v1373_v18 = vld [vmem:[%s2062_s3 + $0x2a0] sm:$0xff] }
 0x165   : > { %985 = vmatpush.msrb.mxu3 %v1373_v18 }
 0x16c   : > { %1346 = vmatmul.msk.f32.gmra.mxu1 %vm260_vm0, %v1342_v19  ;;  %v1372_v19 = vld [vmem:[%s2062_s3 + $0x298] sm:$0xff] }
 0x16d   : > { %1044 = vmatpush.msra.mxu2 %v1372_v19 }
 0x174   : > { %1347 = vmatmul.msk.f32.gmra.mxu1 %vm260_vm0, %v1343_v20  ;;  %v1371_v20 = vld [vmem:[%s2062_s3 + $0x290] sm:$0xff] }
 0x175   : > { %986 = vmatpush.msrb.mxu3 %v1371_v20 }
 0x17c   : > { %1348 = vmatmul.msk.f32.gmra.mxu1 %vm260_vm0, %v1344_v24 }
 0x1a1   : > { %v588_v25 = vpop.f32.mrf.mxu1  ;;  %v646_v59 = vpop.f32.mrf.mxu0 }
 0x1a9   : > { %v591_v60 = vpop.f32.mrf.mxu1  ;;  %v649_v61 = vpop.f32.mrf.mxu0 }
 0x1ad   : > { %v617_v62 = vpop.f32.mrf.mxu2  ;;  %v675_v14 = vpop.f32.mrf.mxu3 }
 0x1ae   : > { %v618_v63 = vadd.f32 %v617_v62, %v588_v25  ;;  %v676_v27 = vadd.f32 %v675_v14, %v646_v59  ;;  %v1370_v25 = vld [vmem:[%s2062_s3 + $0x288] sm:$0xff]  ;;  %v1369_v59 = vld [vmem:[%s2062_s3 + $0x280] sm:$0xff] }
 0x1af   : > { %1045 = vmatpush.msra.mxu2 %v1370_v25  ;;  %987 = vmatpush.msrb.mxu3 %v1369_v59  ;;  %v1366_v62 = vld [vmem:[%s2062_s3 + $0x268] sm:$0xff] }
 0x1b0   : > { %v1362_v14 = vld [vmem:[%s2062_s3 + $0x248] sm:$0xff] }
 0x1b1   : > { %v594_v2 = vpop.f32.mrf.mxu1  ;;  %v652_v3 = vpop.f32.mrf.mxu0 }
 0x1b5   : > { %v620_v4 = vpop.f32.mrf.mxu2  ;;  %v678_v32 = vpop.f32.mrf.mxu3 }
 0x1b6   : > { %v621_v5 = vadd.f32 %v620_v4, %v591_v60  ;;  %v679_v35 = vadd.f32 %v678_v32, %v649_v61  ;;  %v1368_v60 = vld [vmem:[%s2062_s3 + $0x278] sm:$0xff]  ;;  %v1367_v61 = vld [vmem:[%s2062_s3 + $0x270] sm:$0xff] }
 0x1b7   : > { %1046 = vmatpush.msra.mxu2 %v1368_v60  ;;  %988 = vmatpush.msrb.mxu3 %v1367_v61 }
 0x1b9   : > { %v597_v21 = vpop.f32.mrf.mxu1  ;;  %v1890_v22 = vpop.f32.mrf.mxu0  ;;  %1047 = vmatpush.msra.mxu2 %v1366_v62 }
 0x1bd   : > { %v623_v23 = vpop.f32.mrf.mxu2  ;;  %v681_v40 = vpop.f32.mrf.mxu3 }
 0x1be   : > { %v624_v26 = vadd.f32 %v623_v23, %v594_v2  ;;  %v682_v43 = vadd.f32 %v681_v40, %v652_v3  ;;  %v1364_v2 = vld [vmem:[%s2062_s3 + $0x258] sm:$0xff] }
 0x1bf   : > { %1048 = vmatpush.msra.mxu2 %v1364_v2  ;;  %v1360_v23 = vld [vmem:[%s2062_s3 + $0x238] sm:$0xff] }
 0x1c1   : > { %v716_v28 = vpop.f32.mrf.mxu1  ;;  %v774_v29 = vpop.f32.mrf.mxu0  ;;  %1049 = vmatpush.msra.mxu2 %v1362_v14 }
 0x1c2   : > { %v717_v30 = vadd.f32 %v716_v28, %v618_v63  ;;  %v1892_v31 = vadd.f32 %v774_v29, %v676_v27  ;;  %v1365_v63 = vld [vmem:[%s2062_s3 + $0x260] sm:$0xff]  ;;  %v1358_v27 = vld [vmem:[%s2062_s3 + $0x228] sm:$0xff] }
 0x1c3   : > { %989 = vmatpush.msrb.mxu3 %v1365_v63  ;;  %1050 = vmatpush.msra.mxu2 %v1360_v23  ;;  %v1357_v28 = vld [vmem:[%s2062_s3 + $0x220] sm:$0xff] }
 0x1c5   : > { %v626_v33 = vpop.f32.mrf.mxu2  ;;  %1051 = vmatpush.msra.mxu2 %v1358_v27 }
 0x1c6   : > { %v627_v34 = vadd.f32 %v626_v33, %v597_v21  ;;  %v1361_v21 = vld [vmem:[%s2062_s3 + $0x240] sm:$0xff] }
 0x1c9   : > { %v719_v36 = vpop.f32.mrf.mxu1  ;;  %v777_v37 = vpop.f32.mrf.mxu0 }
 0x1ca   : > { %v720_v38 = vadd.f32 %v719_v36, %v621_v5  ;;  %v1894_v39 = vadd.f32 %v777_v37, %v679_v35  ;;  %v1363_v5 = vld [vmem:[%s2062_s3 + $0x250] sm:$0xff] }
 0x1cb   : > { %990 = vmatpush.msrb.mxu3 %v1363_v5 }
 0x1cd   : > { %v745_v41 = vpop.f32.mrf.mxu2  ;;  %991 = vmatpush.msrb.mxu3 %v1361_v21 }
 0x1ce   : > { %v1896_v42 = vadd.f32 %v745_v41, %v717_v30  ;;  %v684_v41 = vpop.f32.mrf.mxu3 }
 0x1cf   : > { %v685_v2 = vadd.f32 %v684_v41, %v1890_v22 }
 0x1d1   : > { %v722_v44 = vpop.f32.mrf.mxu1  ;;  %v780_v45 = vpop.f32.mrf.mxu0 }
 0x1d2   : > { %v723_v46 = vadd.f32 %v722_v44, %v624_v26  ;;  %v1898_v47 = vadd.f32 %v780_v45, %v682_v43  ;;  %v1359_v26 = vld [vmem:[%s2062_s3 + $0x230] sm:$0xff] }
 0x1d3   : > { %992 = vmatpush.msrb.mxu3 %v1359_v26 }
 0x1d5   : > { %v748_v48 = vpop.f32.mrf.mxu2  ;;  %993 = vmatpush.msrb.mxu3 %v1357_v28 }
 0x1d6   : > { %v1900_v49 = vadd.f32 %v748_v48, %v720_v38  ;;  %v803_v43 = vpop.f32.mrf.mxu3 }
 0x1d7   : > { %v804_v54 = vadd.f32 %v803_v43, %v1892_v31 }
 0x1d9   : > { %v725_v50 = vpop.f32.mrf.mxu1  ;;  %v2016_v29 = vpop.f32.mrf.mxu0 }
 0x1da   : > { %v1902_v51 = vadd.f32 %v725_v50, %v627_v34  ;;  %v784_v21 = vadd.f32 %v2016_v29, %v685_v2 }
 0x1dd   : > { %v751_v0 = vpop.f32.mrf.mxu2 }
 0x1de   : > { %v1928_v6 = vadd.f32 %v751_v0, %v723_v46  ;;  %v806_v44 = vpop.f32.mrf.mxu3 }
 0x1df   : > { %v807_v8 = vadd.f32 %v806_v44, %v1894_v39 }
 0x1e1   : > { %v849_v11 = vpop.f32.mrf.mxu1 }
 0x1e2   : > { %1349 = vmatmul.msk.f32.vlgmr.msrb.gmra.mxu2 %vm302_vm1, %v849_v11  ;;  %1353 = vmatmul.msk.f32.vlgmr.msra.gmra.mxu0 %vm302_vm1, %v849_v11 }
 0x1e5   : > { %v2018_v30 = vpop.f32.mrf.mxu2 }
 0x1e6   : > { %v809_v45 = vpop.f32.mrf.mxu3 }
 0x1e7   : > { %v810_v60 = vadd.f32 %v809_v45, %v1898_v47 }
 0x1e9   : > { %v852_v24 = vpop.f32.mrf.mxu1 }
 0x1ea   : > { %1350 = vmatmul.msk.f32.gmra.mxu2 %vm302_vm1, %v852_v24  ;;  %1354 = vmatmul.msk.f32.gmra.mxu0 %vm302_vm1, %v852_v24 }
 0x1ee   : > { %v812_v46 = vpop.f32.mrf.mxu3 }
 0x1ef   : > { %v813_v22 = vadd.f32 %v812_v46, %v784_v21 }
 0x1f1   : > { %v855_v3 = vpop.f32.mrf.mxu1 }
 0x1f2   : > { %1351 = vmatmul.msk.f32.gmra.mxu2 %vm302_vm1, %v855_v3  ;;  %1355 = vmatmul.msk.f32.gmra.mxu0 %vm302_vm1, %v855_v3 }
 0x1f9   : > { %v858_v4 = vpop.f32.mrf.mxu1 }
 0x1fa   : > { %1352 = vmatmul.msk.f32.gmra.mxu2 %vm302_vm1, %v858_v4  ;;  %1356 = vmatmul.msk.f32.gmra.mxu0 %vm302_vm1, %v858_v4 }
 0x25f   : > { %v919_v32 = vpop.f32.mrf.mxu0 }
 0x260   : > { %1391 = vmatmul.msk.f32.vlgmr.msra.gmra.mxu1 %vm558_vm2, %v919_v32  ;;  %1395 = vmatmul.msk.f32.vlgmr.msrb.gmra.mxu0 %vm558_vm2, %v919_v32 }
 0x265   : > { %v890_v33 = vpop.f32.mrf.mxu2 }
 0x266   : > { %994 = vmatmul.f32.vlgmr.msrb.gmra.mxu3 %v890_v33  ;;  %1052 = vmatmul.f32.vlgmr.msra.gmra.mxu2 %v890_v33 }
 0x267   : > { %v922_v34 = vpop.f32.mrf.mxu0 }
 0x268   : > { %1392 = vmatmul.msk.f32.gmra.mxu1 %vm558_vm2, %v922_v34  ;;  %1396 = vmatmul.msk.f32.gmra.mxu0 %vm558_vm2, %v922_v34 }
 0x26d   : > { %v893_v35 = vpop.f32.mrf.mxu2 }
 0x26e   : > { %997 = vmatmul.f32.gmra.mxu3 %v893_v35  ;;  %1055 = vmatmul.f32.gmra.mxu2 %v893_v35 }
 0x26f   : > { %v925_v36 = vpop.f32.mrf.mxu0 }
 0x270   : > { %1393 = vmatmul.msk.f32.gmra.mxu1 %vm558_vm2, %v925_v36  ;;  %1397 = vmatmul.msk.f32.gmra.mxu0 %vm558_vm2, %v925_v36 }
 0x275   : > { %v896_v37 = vpop.f32.mrf.mxu2 }
 0x276   : > { %1000 = vmatmul.f32.gmra.mxu3 %v896_v37  ;;  %1058 = vmatmul.f32.gmra.mxu2 %v896_v37 }
 0x277   : > { %v928_v38 = vpop.f32.mrf.mxu0 }
 0x278   : > { %1394 = vmatmul.msk.f32.gmra.mxu1 %vm558_vm2, %v928_v38  ;;  %1398 = vmatmul.msk.f32.gmra.mxu0 %vm558_vm2, %v928_v38 }
 0x27d   : > { %v899_v40 = vpop.f32.mrf.mxu2 }
 0x27e   : > { %1003 = vmatmul.f32.gmra.mxu3 %v899_v40  ;;  %1061 = vmatmul.f32.gmra.mxu2 %v899_v40 }
 0x2dd   : > { %v1024_v48 = vpop.f32.mrf.mxu1  ;;  %v1082_v50 = vpop.f32.mrf.mxu0 }
 0x2e5   : > { %v1027_v57 = vpop.f32.mrf.mxu1  ;;  %v1085_v58 = vpop.f32.mrf.mxu0 }
 0x2e9   : > { %v995_v52 = vpop.f32.mrf.mxu3  ;;  %v1053_v53 = vpop.f32.mrf.mxu2 }
 0x2ea   : > { %v1025_v55 = vadd.f32 %v1024_v48, %v995_v52  ;;  %v1083_v56 = vadd.f32 %v1082_v50, %v1053_v53 }
 0x2ec   : > { %v1094_v0 = vadd.f32 %v1025_v55, %v1896_v42  ;;  %v1095_v1 = vadd.f32 %v1083_v56, %v804_v54 }
 0x2ed   : > { %v1030_v16 = vpop.f32.mrf.mxu1  ;;  %v1088_v17 = vpop.f32.mrf.mxu0 }
 0x2ee   : > { %1102 = vst [vmem:[%s2033_s9] sm:$0xff] %v1094_v0  ;;  %v1128_v13 = vmul.f32 %v1094_v0, %v1094_v0  ;;  %v1129_v15 = vmul.f32 %v1095_v1, %v1095_v1 }
 0x2ef   : > { %1103 = vst [vmem:[%s2033_s9 + $0x8] sm:$0xff] %v1095_v1 }
 0x2f1   : > { %v998_v7 = vpop.f32.mrf.mxu3  ;;  %v1056_v31 = vpop.f32.mrf.mxu2 }
 0x2f2   : > { %v1028_v9 = vadd.f32 %v1027_v57, %v998_v7  ;;  %v1086_v10 = vadd.f32 %v1085_v58, %v1056_v31 }
 0x2f4   : > { %v1096_v11 = vadd.f32 %v1028_v9, %v1900_v49  ;;  %v1097_v12 = vadd.f32 %v1086_v10, %v807_v8 }
 0x2f5   : > { %v1033_v23 = vpop.f32.mrf.mxu1  ;;  %v1091_v26 = vpop.f32.mrf.mxu0 }
 0x2f6   : > { %1104 = vst [vmem:[%s2033_s9 + $0x10] sm:$0xff] %v1096_v11  ;;  %v1110_v42 = vadd.f32 %v1096_v11, %v1094_v0  ;;  %v1130_v18 = vmul.f32 %v1096_v11, %v1096_v11  ;;  %v1119_v19 = vadd.f32 %v1097_v12, %v1095_v1  ;;  %v1131_v20 = vmul.f32 %v1097_v12, %v1097_v12 }
 0x2f7   : > { %1105 = vst [vmem:[%s2033_s9 + $0x18] sm:$0xff] %v1097_v12 }
 0x2f8   : > { %v1136_v24 = vadd.f32 %v1130_v18, %v1128_v13  ;;  %v1145_v25 = vadd.f32 %v1131_v20, %v1129_v15 }
 0x2f9   : > { %v1001_v39 = vpop.f32.mrf.mxu3  ;;  %v1059_v59 = vpop.f32.mrf.mxu2 }
 0x2fa   : > { %v1031_v49 = vadd.f32 %v1030_v16, %v1001_v39  ;;  %v1089_v61 = vadd.f32 %v1088_v17, %v1059_v59 }
 0x2fc   : > { %v1098_v62 = vadd.f32 %v1031_v49, %v1928_v6  ;;  %v1099_v63 = vadd.f32 %v1089_v61, %v810_v60  ;;  %v755_v6 = vadd.f32 %v2018_v30, %v1902_v51 }
 0x2fe   : > { %1106 = vst [vmem:[%s2033_s9 + $0x20] sm:$0xff] %v1098_v62  ;;  %v1111_v3 = vadd.f32 %v1110_v42, %v1098_v62  ;;  %v1132_v4 = vmul.f32 %v1098_v62, %v1098_v62  ;;  %v1120_v5 = vadd.f32 %v1119_v19, %v1099_v63  ;;  %v1133_v14 = vmul.f32 %v1099_v63, %v1099_v63 }
 0x2ff   : > { %1107 = vst [vmem:[%s2033_s9 + $0x28] sm:$0xff] %v1099_v63 }
 0x300   : > { %v1137_v47 = vadd.f32 %v1136_v24, %v1132_v4  ;;  %v1146_v27 = vadd.f32 %v1145_v25, %v1133_v14 }
 0x301   : > { %v1004_v28 = vpop.f32.mrf.mxu3  ;;  %v1062_v32 = vpop.f32.mrf.mxu2 }
 0x302   : > { %v1034_v33 = vadd.f32 %v1033_v23, %v1004_v28  ;;  %v1092_v34 = vadd.f32 %v1091_v26, %v1062_v32 }
 0x304   : > { %v1100_v35 = vadd.f32 %v1034_v33, %v755_v6  ;;  %v1101_v36 = vadd.f32 %v1092_v34, %v813_v22 }
 0x306   : > { %1108 = vst [vmem:[%s2033_s9 + $0x30] sm:$0xff] %v1100_v35  ;;  %v1112_v37 = vadd.f32 %v1111_v3, %v1100_v35  ;;  %v1134_v38 = vmul.f32 %v1100_v35, %v1100_v35  ;;  %v1121_v40 = vadd.f32 %v1120_v5, %v1101_v36  ;;  %v1135_v29 = vmul.f32 %v1101_v36, %v1101_v36 }
 0x307   : > { %1109 = vst [vmem:[%s2033_s9 + $0x38] sm:$0xff] %v1101_v36 }
 0x308   : > { %v1113_v41 = vrot.slane %v1112_v37, 4  ;;  %v1138_v43 = vadd.f32 %v1137_v47, %v1134_v38  ;;  %v1122_v44 = vrot.slane %v1121_v40, 4  ;;  %v1147_v45 = vadd.f32 %v1146_v27, %v1135_v29 }
 0x30a   : > { %v1114_v48 = vadd.f32 %v1113_v41, %v1112_v37  ;;  %v1139_v50 = vrot.slane %v1138_v43, 4  ;;  %v1123_v52 = vadd.f32 %v1122_v44, %v1121_v40  ;;  %v1148_v53 = vrot.slane %v1147_v45, 4 }
 0x30c   : > { %v1115_v51 = vrot.slane %v1114_v48, 2  ;;  %v1140_v30 = vadd.f32 %v1139_v50, %v1138_v43  ;;  %v1124_v46 = vrot.slane %v1123_v52, 2  ;;  %v1149_v54 = vadd.f32 %v1148_v53, %v1147_v45 }
 0x30e   : > { %v1116_v55 = vadd.f32 %v1115_v51, %v1114_v48  ;;  %v1141_v56 = vrot.slane %v1140_v30, 2  ;;  %v1125_v57 = vadd.f32 %v1124_v46, %v1123_v52  ;;  %v1150_v58 = vrot.slane %v1149_v54, 2 }
 0x310   : > { %v1117_v0 = vrot.slane %v1116_v55, 1  ;;  %v1142_v1 = vadd.f32 %v1141_v56, %v1140_v30  ;;  %v1126_v7 = vrot.slane %v1125_v57, 1  ;;  %v1151_v31 = vadd.f32 %v1150_v58, %v1149_v54 }
 0x312   : > { %v1143_v8 = vrot.slane %v1142_v1, 1  ;;  %v1152_v9 = vrot.slane %v1151_v31, 1  ;;  %v1118_v10 = vadd.f32 %v1117_v0, %v1116_v55  ;;  %v1127_v12 = vadd.f32 %v1126_v7, %v1125_v57 }
 0x314   : > { %v1144_v11 = vadd.f32 %v1143_v8, %v1142_v1  ;;  %v1153_v13 = vadd.f32 %v1152_v9, %v1151_v31 }
 0x316   : > { %v1155_v15 = vsel %vm1154_vm3, %v1118_v10, %v1144_v11  ;;  %v1156_v16 = vsel %vm1154_vm3, %v1127_v12, %v1153_v13 }
 0x317   : > { %v1159_v17 = vrot.slane %v1156_v16, 6 }
 0x319   : > { %v1161_v42 = vsel %vm1160_vm4, %v1155_v15, %v1159_v17 }
 0x31a   : > { %1163 = vst [vmem:[%s237_s13] sm:$0xf] %v1161_v42 }
 0x31b PF: > { %s16_s18 = sadd.s32 1, %s1420_s18  }
 0x31c   : > { %p13_p4 = scmp.ge.s32.totalorder %s16_s18, 4  }
 0x31e   :  { %15 = sbr.rel (!%p13_p4) target bundleno = 1 (0x1), region = 82 }

</bundles_post_ra>
